<compile_context>
chip_gen: v7x
topology: tpu7x:2x2x1
jax: 0.10.0
libtpu: 0.0.40
codegen_flags: <defaults>
</compile_context>

<pallas_src>
import jax
import jax.numpy as jnp
import numpy as np
from jax import lax
from jax.experimental import pallas as pl
from jax.experimental.pallas import tpu as pltpu

# ---- problem constants implied by the module ----
N = 2
C_IN, C_OUT, G = 4, 6, 2
CIN_G, COUT_G = C_IN // G, C_OUT // G
KH, KW = 3, 5
SH, SW = 2, 1          # stride
PH, PW = 4, 2          # padding
DH, DW = 3, 1          # dilation
OPH, OPW = 1, 0        # output_padding
H_IN = W_IN = 16

H_OUT = (H_IN - 1) * SH - 2 * PH + DH * (KH - 1) + OPH + 1   # 30
W_OUT = (W_IN - 1) * SW - 2 * PW + DW * (KW - 1) + OPW + 1   # 16

# ---- lane-packed layout ----
NSEG = G * COUT_G            # 6   segments; segment s == absolute output channel s
W_SEG = W_OUT + KW - 1       # 20  cols per segment (W_OUT + kw-shift headroom = W pad)
W_LANES = NSEG * W_SEG       # 120 (single lane tile, 94% dense)
NHE = H_OUT // SH            # 15  rows per parity plane
H_SLAB = H_IN + 2            # 18  input rows + one zero row above and below
SLAB_W = 128                 # full lane tile; lanes >= W_LANES stay zero

# (kh' tap, slab row offset r0, output-row parity):
#   output row h = 2*i + parity uses input row ih = r0 + i - 1 (slab row r0 + i)
#   and weight kh = KH-1-kh'.
TAPS = ((0, 0, 0),   # weight kh = 2 -> even rows, ih = he - 1
        (1, 2, 1),   # weight kh = 1 -> odd  rows, ih = ho + 1
        (2, 3, 0))   # weight kh = 0 -> even rows, ih = he + 2


def _make_kernel(nb):
    def kernel(w_ref, b_ref, x_ref, o_ref, slab_ref):
        # w_ref:    VMEM (CIN_G, KH, KW, W_LANES)  flipped weights, replicated per segment
        # b_ref:    VMEM (1, W_LANES)              bias replicated per segment
        # x_ref:    VMEM (nb, C_IN, H_IN, W_IN)
        # o_ref:    VMEM (nb, 2, NHE, W_LANES)     [batch, parity, row, seg*W_SEG + w]
        # slab_ref: VMEM (CIN_G, H_SLAB, SLAB_W)   lane-packed zero-padded input
        #
        # Zero the pad regions once per invocation; data regions are overwritten
        # per batch.  (Unconditional -> safe under megacore sharding.)
        slab_ref[...] = jnp.zeros_like(slab_ref)
        for n in range(nb):
            # ---- prologue: 12 region copies build the lane-packed input slabs.
            # slab[p, 1+ih, s*W_SEG + PW + iw] = x[n, 2*(s//3)+p, ih, iw]
            for p in range(CIN_G):
                for s in range(NSEG):
                    c = (s // COUT_G) * CIN_G + p
                    lo = s * W_SEG + PW
                    slab_ref[p, 1:1 + H_IN, lo:lo + W_IN] = x_ref[n, c]

            # ---- accumulate both parity planes, all 6 output channels at once
            bias_row = b_ref[...]                                   # (1, W_LANES)
            acc = [jnp.broadcast_to(bias_row, (NHE, W_LANES)),      # even output rows
                   jnp.broadcast_to(bias_row, (NHE, W_LANES))]      # odd output rows
            for p in range(CIN_G):
                sp = slab_ref[p]                                    # (H_SLAB, SLAB_W)
                for khp, r0, par in TAPS:
                    rows = sp[r0:r0 + NHE, :]                       # (NHE, SLAB_W)
                    for kwp in range(KW):
                        wv = w_ref[p, khp, kwp].reshape(1, W_LANES)
                        acc[par] = acc[par] + rows[:, kwp:kwp + W_LANES] * wv

            o_ref[n, 0] = acc[0]
            o_ref[n, 1] = acc[1]
    return kernel


def _batches_per_step():
    # v7x (and v4/v5p megacore) have 2 TensorCores per chip: keep one batch per
    # grid step so the "parallel" batch axis shards across the cores.
    # Single-TC chips (v5e/v6e) fold both batches into one grid step to pay
    # the ~0.35us per-step overhead once.
    try:
        kind = jax.devices()[0].device_kind.lower()
    except Exception:
        kind = ""
    multi_tc = any(t in kind for t in ("v7", "7x", "v4", "v5p"))
    return 1 if multi_tc else N


_NB = _batches_per_step()


@jax.jit
def conv_transpose2d(x, weight, bias):
    """x: (N, C_IN, H_IN, W_IN) f32; weight: (C_IN, COUT_G, KH, KW); bias: (C_OUT,)."""
    # ---- layout plumbing: flip + replicate weights/bias per 20-lane segment
    wf = weight[:, :, ::-1, ::-1]                            # flip kh, kw
    wp = (wf.reshape(G, CIN_G, COUT_G, KH, KW)
            .transpose(1, 3, 4, 0, 2)                        # (p, kh', kw', g, oc)
            .reshape(CIN_G, KH, KW, NSEG))
    w_packed = jnp.repeat(wp, W_SEG, axis=-1)                # (CIN_G, KH, KW, 120)
    b_packed = jnp.repeat(bias, W_SEG)[None, :]              # (1, 120)

    nb = _NB
    y = pl.pallas_call(
        _make_kernel(nb),
        out_shape=jax.ShapeDtypeStruct((N, 2, NHE, W_LANES), jnp.float32),
        grid=(N // nb,),
        in_specs=[
            pl.BlockSpec((CIN_G, KH, KW, W_LANES), lambda n: (0, 0, 0, 0)),
            pl.BlockSpec((1, W_LANES), lambda n: (0, 0)),
            pl.BlockSpec((nb, C_IN, H_IN, W_IN), lambda n: (n, 0, 0, 0)),
        ],
        out_specs=pl.BlockSpec((nb, 2, NHE, W_LANES), lambda n: (n, 0, 0, 0)),
        scratch_shapes=[pltpu.VMEM((CIN_G, H_SLAB, SLAB_W), jnp.float32)],
        compiler_params=pltpu.CompilerParams(dimension_semantics=("parallel",)),
    )(w_packed, b_packed, x)

    # ---- layout plumbing back: (N, parity, he, seg*20+w) -> (N, C_OUT, H_OUT, W_OUT)
    y = y.reshape(N, 2, NHE, NSEG, W_SEG)[..., :W_OUT]       # (N, 2, 15, 6, 16)
    return y.transpose(0, 3, 2, 1, 4).reshape(N, C_OUT, H_OUT, W_OUT)


if __name__ == "__main__":
    key = jax.random.PRNGKey(0)
    kx, kwgt, kb = jax.random.split(key, 3)
    x = jax.random.normal(kx, (N, C_IN, H_IN, W_IN), jnp.float32)
    bound = 1.0 / np.sqrt(CIN_G * KH * KW)
    weight = jax.random.uniform(kwgt, (C_IN, COUT_G, KH, KW), jnp.float32, -bound, bound)
    bias = jax.random.uniform(kb, (C_OUT,), jnp.float32, -bound, bound)

    y = jax.block_until_ready(conv_transpose2d(x, weight, bias))
    assert y.shape == (N, C_OUT, H_OUT, W_OUT)

    # Reference: same math as PyTorch ConvTranspose2d, via lax grouped dilated conv.
    PADT = DH * (KH - 1) - PH
    PADB = PADT + OPH
    PADL = DW * (KW - 1) - PW
    PADR = PADL + OPW
    w_g = weight.reshape(G, CIN_G, COUT_G, KH, KW)[:, :, :, ::-1, ::-1]
    k_conv = w_g.transpose(0, 2, 1, 3, 4).reshape(C_OUT, CIN_G, KH, KW)
    ref = lax.conv_general_dilated(
        x, k_conv, window_strides=(1, 1),
        padding=((PADT, PADB), (PADL, PADR)),
        lhs_dilation=(SH, SW), rhs_dilation=(DH, DW),
        dimension_numbers=("NCHW", "OIHW", "NCHW"),
        feature_group_count=G,
        precision=lax.Precision.HIGHEST,
    ) + bias[None, :, None, None]
    np.testing.assert_allclose(np.asarray(y), np.asarray(ref), rtol=1e-4, atol=1e-4)
    print("KERNEL_OK")
</pallas_src>

<mosaic_0001>
module attributes {stable_mosaic.version = 11 : i64} {
  func.func @kernel(%arg0: i32, %arg1: memref<2x3x5x120xf32, #tpu.memory_space<vmem>>, %arg2: memref<1x120xf32, #tpu.memory_space<vmem>>, %arg3: memref<2x4x16x16xf32, #tpu.memory_space<vmem>>, %arg4: memref<2x2x15x120xf32, #tpu.memory_space<vmem>>, %arg5: memref<2x18x128xf32, #tpu.memory_space<vmem>>) attributes {dimension_semantics = [#tpu.dimension_semantics<parallel>], iteration_bounds = array<i64: 1>, scalar_prefetch = 0 : i64, scratch_operands = 1 : i64, tpu.core_type = #tpu.core_type<tc>, window_params = [{pipeline_mode = #tpu.pipeline_mode<synchronous>, transform_indices = @transform_0, window_bounds = array<i64: 2, 3, 5, 120>}, {pipeline_mode = #tpu.pipeline_mode<synchronous>, transform_indices = @transform_1, window_bounds = array<i64: 1, 120>}, {transform_indices = @transform_2, window_bounds = array<i64: 2, 4, 16, 16>}, {transform_indices = @transform_3, window_bounds = array<i64: 2, 2, 15, 120>}]} {
    %cst = arith.constant 0.000000e+00 : f32
    %0 = vector.broadcast %cst : f32 to vector<2x18x128xf32>
    %c0 = arith.constant 0 : index
    %c0_0 = arith.constant 0 : index
    %c0_1 = arith.constant 0 : index
    %1 = vector.load %arg5[%c0, %c0_0, %c0_1] : memref<2x18x128xf32, #tpu.memory_space<vmem>>, vector<2x18x128xf32>
    tpu.vector_store %arg5[%c0, %c0_0, %c0_1], %0 {strides = array<i32>} : memref<2x18x128xf32, #tpu.memory_space<vmem>>, vector<2x18x128xf32>,
    %c0_2 = arith.constant 0 : index
    %c0_3 = arith.constant 0 : index
    %c0_4 = arith.constant 0 : index
    %c0_5 = arith.constant 0 : index
    %2 = vector.load %arg3[%c0_2, %c0_3, %c0_4, %c0_5] : memref<2x4x16x16xf32, #tpu.memory_space<vmem>>, vector<1x1x16x16xf32>
    %3 = vector.shape_cast %2 : vector<1x1x16x16xf32> to vector<16x16xf32>
    %c0_6 = arith.constant 0 : index
    %c1 = arith.constant 1 : index
    %c2 = arith.constant 2 : index
    %4 = vector.load %arg5[%c0_6, %c1, %c2] : memref<2x18x128xf32, #tpu.memory_space<vmem>>, vector<1x16x16xf32>
    %5 = vector.shape_cast %4 : vector<1x16x16xf32> to vector<16x16xf32>
    %6 = vector.shape_cast %3 : vector<16x16xf32> to vector<1x16x16xf32>
    tpu.vector_store %arg5[%c0_6, %c1, %c2], %6 {strides = array<i32>} : memref<2x18x128xf32, #tpu.memory_space<vmem>>, vector<1x16x16xf32>,
    %c0_7 = arith.constant 0 : index
    %c0_8 = arith.constant 0 : index
    %c0_9 = arith.constant 0 : index
    %c0_10 = arith.constant 0 : index
    %7 = vector.load %arg3[%c0_7, %c0_8, %c0_9, %c0_10] : memref<2x4x16x16xf32, #tpu.memory_space<vmem>>, vector<1x1x16x16xf32>
    %8 = vector.shape_cast %7 : vector<1x1x16x16xf32> to vector<16x16xf32>
    %c0_11 = arith.constant 0 : index
    %c1_12 = arith.constant 1 : index
    %c22 = arith.constant 22 : index
    %9 = vector.load %arg5[%c0_11, %c1_12, %c22] : memref<2x18x128xf32, #tpu.memory_space<vmem>>, vector<1x16x16xf32>
    %10 = vector.shape_cast %9 : vector<1x16x16xf32> to vector<16x16xf32>
    %11 = vector.shape_cast %8 : vector<16x16xf32> to vector<1x16x16xf32>
    tpu.vector_store %arg5[%c0_11, %c1_12, %c22], %11 {strides = array<i32>} : memref<2x18x128xf32, #tpu.memory_space<vmem>>, vector<1x16x16xf32>,
    %c0_13 = arith.constant 0 : index
    %c0_14 = arith.constant 0 : index
    %c0_15 = arith.constant 0 : index
    %c0_16 = arith.constant 0 : index
    %12 = vector.load %arg3[%c0_13, %c0_14, %c0_15, %c0_16] : memref<2x4x16x16xf32, #tpu.memory_space<vmem>>, vector<1x1x16x16xf32>
    %13 = vector.shape_cast %12 : vector<1x1x16x16xf32> to vector<16x16xf32>
    %c0_17 = arith.constant 0 : index
    %c1_18 = arith.constant 1 : index
    %c42 = arith.constant 42 : index
    %14 = vector.load %arg5[%c0_17, %c1_18, %c42] : memref<2x18x128xf32, #tpu.memory_space<vmem>>, vector<1x16x16xf32>
    %15 = vector.shape_cast %14 : vector<1x16x16xf32> to vector<16x16xf32>
    %16 = vector.shape_cast %13 : vector<16x16xf32> to vector<1x16x16xf32>
    tpu.vector_store %arg5[%c0_17, %c1_18, %c42], %16 {strides = array<i32>} : memref<2x18x128xf32, #tpu.memory_space<vmem>>, vector<1x16x16xf32>,
    %c0_19 = arith.constant 0 : index
    %c2_20 = arith.constant 2 : index
    %c0_21 = arith.constant 0 : index
    %c0_22 = arith.constant 0 : index
    %17 = vector.load %arg3[%c0_19, %c2_20, %c0_21, %c0_22] : memref<2x4x16x16xf32, #tpu.memory_space<vmem>>, vector<1x1x16x16xf32>
    %18 = vector.shape_cast %17 : vector<1x1x16x16xf32> to vector<16x16xf32>
    %c0_23 = arith.constant 0 : index
    %c1_24 = arith.constant 1 : index
    %c62 = arith.constant 62 : index
    %19 = vector.load %arg5[%c0_23, %c1_24, %c62] : memref<2x18x128xf32, #tpu.memory_space<vmem>>, vector<1x16x16xf32>
    %20 = vector.shape_cast %19 : vector<1x16x16xf32> to vector<16x16xf32>
    %21 = vector.shape_cast %18 : vector<16x16xf32> to vector<1x16x16xf32>
    tpu.vector_store %arg5[%c0_23, %c1_24, %c62], %21 {strides = array<i32>} : memref<2x18x128xf32, #tpu.memory_space<vmem>>, vector<1x16x16xf32>,
    %c0_25 = arith.constant 0 : index
    %c2_26 = arith.constant 2 : index
    %c0_27 = arith.constant 0 : index
    %c0_28 = arith.constant 0 : index
    %22 = vector.load %arg3[%c0_25, %c2_26, %c0_27, %c0_28] : memref<2x4x16x16xf32, #tpu.memory_space<vmem>>, vector<1x1x16x16xf32>
    %23 = vector.shape_cast %22 : vector<1x1x16x16xf32> to vector<16x16xf32>
    %c0_29 = arith.constant 0 : index
    %c1_30 = arith.constant 1 : index
    %c82 = arith.constant 82 : index
    %24 = vector.load %arg5[%c0_29, %c1_30, %c82] : memref<2x18x128xf32, #tpu.memory_space<vmem>>, vector<1x16x16xf32>
    %25 = vector.shape_cast %24 : vector<1x16x16xf32> to vector<16x16xf32>
    %26 = vector.shape_cast %23 : vector<16x16xf32> to vector<1x16x16xf32>
    tpu.vector_store %arg5[%c0_29, %c1_30, %c82], %26 {strides = array<i32>} : memref<2x18x128xf32, #tpu.memory_space<vmem>>, vector<1x16x16xf32>,
    %c0_31 = arith.constant 0 : index
    %c2_32 = arith.constant 2 : index
    %c0_33 = arith.constant 0 : index
    %c0_34 = arith.constant 0 : index
    %27 = vector.load %arg3[%c0_31, %c2_32, %c0_33, %c0_34] : memref<2x4x16x16xf32, #tpu.memory_space<vmem>>, vector<1x1x16x16xf32>
    %28 = vector.shape_cast %27 : vector<1x1x16x16xf32> to vector<16x16xf32>
    %c0_35 = arith.constant 0 : index
    %c1_36 = arith.constant 1 : index
    %c102 = arith.constant 102 : index
    %29 = vector.load %arg5[%c0_35, %c1_36, %c102] : memref<2x18x128xf32, #tpu.memory_space<vmem>>, vector<1x16x16xf32>
    %30 = vector.shape_cast %29 : vector<1x16x16xf32> to vector<16x16xf32>
    %31 = vector.shape_cast %28 : vector<16x16xf32> to vector<1x16x16xf32>
    tpu.vector_store %arg5[%c0_35, %c1_36, %c102], %31 {strides = array<i32>} : memref<2x18x128xf32, #tpu.memory_space<vmem>>, vector<1x16x16xf32>,
    %c0_37 = arith.constant 0 : index
    %c1_38 = arith.constant 1 : index
    %c0_39 = arith.constant 0 : index
    %c0_40 = arith.constant 0 : index
    %32 = vector.load %arg3[%c0_37, %c1_38, %c0_39, %c0_40] : memref<2x4x16x16xf32, #tpu.memory_space<vmem>>, vector<1x1x16x16xf32>
    %33 = vector.shape_cast %32 : vector<1x1x16x16xf32> to vector<16x16xf32>
    %c1_41 = arith.constant 1 : index
    %c1_42 = arith.constant 1 : index
    %c2_43 = arith.constant 2 : index
    %34 = vector.load %arg5[%c1_41, %c1_42, %c2_43] : memref<2x18x128xf32, #tpu.memory_space<vmem>>, vector<1x16x16xf32>
    %35 = vector.shape_cast %34 : vector<1x16x16xf32> to vector<16x16xf32>
    %36 = vector.shape_cast %33 : vector<16x16xf32> to vector<1x16x16xf32>
    tpu.vector_store %arg5[%c1_41, %c1_42, %c2_43], %36 {strides = array<i32>} : memref<2x18x128xf32, #tpu.memory_space<vmem>>, vector<1x16x16xf32>,
    %c0_44 = arith.constant 0 : index
    %c1_45 = arith.constant 1 : index
    %c0_46 = arith.constant 0 : index
    %c0_47 = arith.constant 0 : index
    %37 = vector.load %arg3[%c0_44, %c1_45, %c0_46, %c0_47] : memref<2x4x16x16xf32, #tpu.memory_space<vmem>>, vector<1x1x16x16xf32>
    %38 = vector.shape_cast %37 : vector<1x1x16x16xf32> to vector<16x16xf32>
    %c1_48 = arith.constant 1 : index
    %c1_49 = arith.constant 1 : index
    %c22_50 = arith.constant 22 : index
    %39 = vector.load %arg5[%c1_48, %c1_49, %c22_50] : memref<2x18x128xf32, #tpu.memory_space<vmem>>, vector<1x16x16xf32>
    %40 = vector.shape_cast %39 : vector<1x16x16xf32> to vector<16x16xf32>
    %41 = vector.shape_cast %38 : vector<16x16xf32> to vector<1x16x16xf32>
    tpu.vector_store %arg5[%c1_48, %c1_49, %c22_50], %41 {strides = array<i32>} : memref<2x18x128xf32, #tpu.memory_space<vmem>>, vector<1x16x16xf32>,
    %c0_51 = arith.constant 0 : index
    %c1_52 = arith.constant 1 : index
    %c0_53 = arith.constant 0 : index
    %c0_54 = arith.constant 0 : index
    %42 = vector.load %arg3[%c0_51, %c1_52, %c0_53, %c0_54] : memref<2x4x16x16xf32, #tpu.memory_space<vmem>>, vector<1x1x16x16xf32>
    %43 = vector.shape_cast %42 : vector<1x1x16x16xf32> to vector<16x16xf32>
    %c1_55 = arith.constant 1 : index
    %c1_56 = arith.constant 1 : index
    %c42_57 = arith.constant 42 : index
    %44 = vector.load %arg5[%c1_55, %c1_56, %c42_57] : memref<2x18x128xf32, #tpu.memory_space<vmem>>, vector<1x16x16xf32>
    %45 = vector.shape_cast %44 : vector<1x16x16xf32> to vector<16x16xf32>
    %46 = vector.shape_cast %43 : vector<16x16xf32> to vector<1x16x16xf32>
    tpu.vector_store %arg5[%c1_55, %c1_56, %c42_57], %46 {strides = array<i32>} : memref<2x18x128xf32, #tpu.memory_space<vmem>>, vector<1x16x16xf32>,
    %c0_58 = arith.constant 0 : index
    %c3 = arith.constant 3 : index
    %c0_59 = arith.constant 0 : index
    %c0_60 = arith.constant 0 : index
    %47 = vector.load %arg3[%c0_58, %c3, %c0_59, %c0_60] : memref<2x4x16x16xf32, #tpu.memory_space<vmem>>, vector<1x1x16x16xf32>
    %48 = vector.shape_cast %47 : vector<1x1x16x16xf32> to vector<16x16xf32>
    %c1_61 = arith.constant 1 : index
    %c1_62 = arith.constant 1 : index
    %c62_63 = arith.constant 62 : index
    %49 = vector.load %arg5[%c1_61, %c1_62, %c62_63] : memref<2x18x128xf32, #tpu.memory_space<vmem>>, vector<1x16x16xf32>
    %50 = vector.shape_cast %49 : vector<1x16x16xf32> to vector<16x16xf32>
    %51 = vector.shape_cast %48 : vector<16x16xf32> to vector<1x16x16xf32>
    tpu.vector_store %arg5[%c1_61, %c1_62, %c62_63], %51 {strides = array<i32>} : memref<2x18x128xf32, #tpu.memory_space<vmem>>, vector<1x16x16xf32>,
    %c0_64 = arith.constant 0 : index
    %c3_65 = arith.constant 3 : index
    %c0_66 = arith.constant 0 : index
    %c0_67 = arith.constant 0 : index
    %52 = vector.load %arg3[%c0_64, %c3_65, %c0_66, %c0_67] : memref<2x4x16x16xf32, #tpu.memory_space<vmem>>, vector<1x1x16x16xf32>
    %53 = vector.shape_cast %52 : vector<1x1x16x16xf32> to vector<16x16xf32>
    %c1_68 = arith.constant 1 : index
    %c1_69 = arith.constant 1 : index
    %c82_70 = arith.constant 82 : index
    %54 = vector.load %arg5[%c1_68, %c1_69, %c82_70] : memref<2x18x128xf32, #tpu.memory_space<vmem>>, vector<1x16x16xf32>
    %55 = vector.shape_cast %54 : vector<1x16x16xf32> to vector<16x16xf32>
    %56 = vector.shape_cast %53 : vector<16x16xf32> to vector<1x16x16xf32>
    tpu.vector_store %arg5[%c1_68, %c1_69, %c82_70], %56 {strides = array<i32>} : memref<2x18x128xf32, #tpu.memory_space<vmem>>, vector<1x16x16xf32>,
    %c0_71 = arith.constant 0 : index
    %c3_72 = arith.constant 3 : index
    %c0_73 = arith.constant 0 : index
    %c0_74 = arith.constant 0 : index
    %57 = vector.load %arg3[%c0_71, %c3_72, %c0_73, %c0_74] : memref<2x4x16x16xf32, #tpu.memory_space<vmem>>, vector<1x1x16x16xf32>
    %58 = vector.shape_cast %57 : vector<1x1x16x16xf32> to vector<16x16xf32>
    %c1_75 = arith.constant 1 : index
    %c1_76 = arith.constant 1 : index
    %c102_77 = arith.constant 102 : index
    %59 = vector.load %arg5[%c1_75, %c1_76, %c102_77] : memref<2x18x128xf32, #tpu.memory_space<vmem>>, vector<1x16x16xf32>
    %60 = vector.shape_cast %59 : vector<1x16x16xf32> to vector<16x16xf32>
    %61 = vector.shape_cast %58 : vector<16x16xf32> to vector<1x16x16xf32>
    tpu.vector_store %arg5[%c1_75, %c1_76, %c102_77], %61 {strides = array<i32>} : memref<2x18x128xf32, #tpu.memory_space<vmem>>, vector<1x16x16xf32>,
    %c0_78 = arith.constant 0 : index
    %c0_79 = arith.constant 0 : index
    %62 = vector.load %arg2[%c0_78, %c0_79] : memref<1x120xf32, #tpu.memory_space<vmem>>, vector<1x120xf32>
    %63 = vector.shape_cast %62 : vector<1x120xf32> to vector<1x120xf32>
    %64 = vector.broadcast %63 : vector<1x120xf32> to vector<15x120xf32>
    %65 = vector.shape_cast %62 : vector<1x120xf32> to vector<1x120xf32>
    %66 = vector.broadcast %65 : vector<1x120xf32> to vector<15x120xf32>
    %c0_80 = arith.constant 0 : index
    %c0_81 = arith.constant 0 : index
    %c0_82 = arith.constant 0 : index
    %67 = vector.load %arg5[%c0_80, %c0_81, %c0_82] : memref<2x18x128xf32, #tpu.memory_space<vmem>>, vector<1x18x128xf32>
    %68 = vector.shape_cast %67 : vector<1x18x128xf32> to vector<18x128xf32>
    %69 = vector.extract_strided_slice %68 {offsets = [0, 0], sizes = [15, 128], strides = [1, 1]} : vector<18x128xf32> to vector<15x128xf32>
    %c0_83 = arith.constant 0 : index
    %c0_84 = arith.constant 0 : index
    %c0_85 = arith.constant 0 : index
    %c0_86 = arith.constant 0 : index
    %70 = vector.load %arg1[%c0_83, %c0_84, %c0_85, %c0_86] : memref<2x3x5x120xf32, #tpu.memory_space<vmem>>, vector<1x1x1x120xf32>
    %71 = vector.shape_cast %70 : vector<1x1x1x120xf32> to vector<120xf32>
    %72 = vector.shape_cast %71 : vector<120xf32> to vector<1x120xf32>
    %73 = vector.extract_strided_slice %69 {offsets = [0, 0], sizes = [15, 120], strides = [1, 1]} : vector<15x128xf32> to vector<15x120xf32>
    %74 = vector.broadcast %72 : vector<1x120xf32> to vector<15x120xf32>
    %75 = arith.mulf %73, %74 : vector<15x120xf32>
    %76 = arith.addf %64, %75 : vector<15x120xf32>
    %c0_87 = arith.constant 0 : index
    %c0_88 = arith.constant 0 : index
    %c1_89 = arith.constant 1 : index
    %c0_90 = arith.constant 0 : index
    %77 = vector.load %arg1[%c0_87, %c0_88, %c1_89, %c0_90] : memref<2x3x5x120xf32, #tpu.memory_space<vmem>>, vector<1x1x1x120xf32>
    %78 = vector.shape_cast %77 : vector<1x1x1x120xf32> to vector<120xf32>
    %79 = vector.shape_cast %78 : vector<120xf32> to vector<1x120xf32>
    %80 = vector.extract_strided_slice %69 {offsets = [0, 1], sizes = [15, 120], strides = [1, 1]} : vector<15x128xf32> to vector<15x120xf32>
    %81 = vector.broadcast %79 : vector<1x120xf32> to vector<15x120xf32>
    %82 = arith.mulf %80, %81 : vector<15x120xf32>
    %83 = arith.addf %76, %82 : vector<15x120xf32>
    %c0_91 = arith.constant 0 : index
    %c0_92 = arith.constant 0 : index
    %c2_93 = arith.constant 2 : index
    %c0_94 = arith.constant 0 : index
    %84 = vector.load %arg1[%c0_91, %c0_92, %c2_93, %c0_94] : memref<2x3x5x120xf32, #tpu.memory_space<vmem>>, vector<1x1x1x120xf32>
    %85 = vector.shape_cast %84 : vector<1x1x1x120xf32> to vector<120xf32>
    %86 = vector.shape_cast %85 : vector<120xf32> to vector<1x120xf32>
    %87 = vector.extract_strided_slice %69 {offsets = [0, 2], sizes = [15, 120], strides = [1, 1]} : vector<15x128xf32> to vector<15x120xf32>
    %88 = vector.broadcast %86 : vector<1x120xf32> to vector<15x120xf32>
    %89 = arith.mulf %87, %88 : vector<15x120xf32>
    %90 = arith.addf %83, %89 : vector<15x120xf32>
    %c0_95 = arith.constant 0 : index
    %c0_96 = arith.constant 0 : index
    %c3_97 = arith.constant 3 : index
    %c0_98 = arith.constant 0 : index
    %91 = vector.load %arg1[%c0_95, %c0_96, %c3_97, %c0_98] : memref<2x3x5x120xf32, #tpu.memory_space<vmem>>, vector<1x1x1x120xf32>
    %92 = vector.shape_cast %91 : vector<1x1x1x120xf32> to vector<120xf32>
    %93 = vector.shape_cast %92 : vector<120xf32> to vector<1x120xf32>
    %94 = vector.extract_strided_slice %69 {offsets = [0, 3], sizes = [15, 120], strides = [1, 1]} : vector<15x128xf32> to vector<15x120xf32>
    %95 = vector.broadcast %93 : vector<1x120xf32> to vector<15x120xf32>
    %96 = arith.mulf %94, %95 : vector<15x120xf32>
    %97 = arith.addf %90, %96 : vector<15x120xf32>
    %c0_99 = arith.constant 0 : index
    %c0_100 = arith.constant 0 : index
    %c4 = arith.constant 4 : index
    %c0_101 = arith.constant 0 : index
    %98 = vector.load %arg1[%c0_99, %c0_100, %c4, %c0_101] : memref<2x3x5x120xf32, #tpu.memory_space<vmem>>, vector<1x1x1x120xf32>
    %99 = vector.shape_cast %98 : vector<1x1x1x120xf32> to vector<120xf32>
    %100 = vector.shape_cast %99 : vector<120xf32> to vector<1x120xf32>
    %101 = vector.extract_strided_slice %69 {offsets = [0, 4], sizes = [15, 120], strides = [1, 1]} : vector<15x128xf32> to vector<15x120xf32>
    %102 = vector.broadcast %100 : vector<1x120xf32> to vector<15x120xf32>
    %103 = arith.mulf %101, %102 : vector<15x120xf32>
    %104 = arith.addf %97, %103 : vector<15x120xf32>
    %105 = vector.extract_strided_slice %68 {offsets = [2, 0], sizes = [15, 128], strides = [1, 1]} : vector<18x128xf32> to vector<15x128xf32>
    %c0_102 = arith.constant 0 : index
    %c1_103 = arith.constant 1 : index
    %c0_104 = arith.constant 0 : index
    %c0_105 = arith.constant 0 : index
    %106 = vector.load %arg1[%c0_102, %c1_103, %c0_104, %c0_105] : memref<2x3x5x120xf32, #tpu.memory_space<vmem>>, vector<1x1x1x120xf32>
    %107 = vector.shape_cast %106 : vector<1x1x1x120xf32> to vector<120xf32>
    %108 = vector.shape_cast %107 : vector<120xf32> to vector<1x120xf32>
    %109 = vector.extract_strided_slice %105 {offsets = [0, 0], sizes = [15, 120], strides = [1, 1]} : vector<15x128xf32> to vector<15x120xf32>
    %110 = vector.broadcast %108 : vector<1x120xf32> to vector<15x120xf32>
    %111 = arith.mulf %109, %110 : vector<15x120xf32>
    %112 = arith.addf %66, %111 : vector<15x120xf32>
    %c0_106 = arith.constant 0 : index
    %c1_107 = arith.constant 1 : index
    %c1_108 = arith.constant 1 : index
    %c0_109 = arith.constant 0 : index
    %113 = vector.load %arg1[%c0_106, %c1_107, %c1_108, %c0_109] : memref<2x3x5x120xf32, #tpu.memory_space<vmem>>, vector<1x1x1x120xf32>
    %114 = vector.shape_cast %113 : vector<1x1x1x120xf32> to vector<120xf32>
    %115 = vector.shape_cast %114 : vector<120xf32> to vector<1x120xf32>
    %116 = vector.extract_strided_slice %105 {offsets = [0, 1], sizes = [15, 120], strides = [1, 1]} : vector<15x128xf32> to vector<15x120xf32>
    %117 = vector.broadcast %115 : vector<1x120xf32> to vector<15x120xf32>
    %118 = arith.mulf %116, %117 : vector<15x120xf32>
    %119 = arith.addf %112, %118 : vector<15x120xf32>
    %c0_110 = arith.constant 0 : index
    %c1_111 = arith.constant 1 : index
    %c2_112 = arith.constant 2 : index
    %c0_113 = arith.constant 0 : index
    %120 = vector.load %arg1[%c0_110, %c1_111, %c2_112, %c0_113] : memref<2x3x5x120xf32, #tpu.memory_space<vmem>>, vector<1x1x1x120xf32>
    %121 = vector.shape_cast %120 : vector<1x1x1x120xf32> to vector<120xf32>
    %122 = vector.shape_cast %121 : vector<120xf32> to vector<1x120xf32>
    %123 = vector.extract_strided_slice %105 {offsets = [0, 2], sizes = [15, 120], strides = [1, 1]} : vector<15x128xf32> to vector<15x120xf32>
    %124 = vector.broadcast %122 : vector<1x120xf32> to vector<15x120xf32>
    %125 = arith.mulf %123, %124 : vector<15x120xf32>
    %126 = arith.addf %119, %125 : vector<15x120xf32>
    %c0_114 = arith.constant 0 : index
    %c1_115 = arith.constant 1 : index
    %c3_116 = arith.constant 3 : index
    %c0_117 = arith.constant 0 : index
    %127 = vector.load %arg1[%c0_114, %c1_115, %c3_116, %c0_117] : memref<2x3x5x120xf32, #tpu.memory_space<vmem>>, vector<1x1x1x120xf32>
    %128 = vector.shape_cast %127 : vector<1x1x1x120xf32> to vector<120xf32>
    %129 = vector.shape_cast %128 : vector<120xf32> to vector<1x120xf32>
    %130 = vector.extract_strided_slice %105 {offsets = [0, 3], sizes = [15, 120], strides = [1, 1]} : vector<15x128xf32> to vector<15x120xf32>
    %131 = vector.broadcast %129 : vector<1x120xf32> to vector<15x120xf32>
    %132 = arith.mulf %130, %131 : vector<15x120xf32>
    %133 = arith.addf %126, %132 : vector<15x120xf32>
    %c0_118 = arith.constant 0 : index
    %c1_119 = arith.constant 1 : index
    %c4_120 = arith.constant 4 : index
    %c0_121 = arith.constant 0 : index
    %134 = vector.load %arg1[%c0_118, %c1_119, %c4_120, %c0_121] : memref<2x3x5x120xf32, #tpu.memory_space<vmem>>, vector<1x1x1x120xf32>
    %135 = vector.shape_cast %134 : vector<1x1x1x120xf32> to vector<120xf32>
    %136 = vector.shape_cast %135 : vector<120xf32> to vector<1x120xf32>
    %137 = vector.extract_strided_slice %105 {offsets = [0, 4], sizes = [15, 120], strides = [1, 1]} : vector<15x128xf32> to vector<15x120xf32>
    %138 = vector.broadcast %136 : vector<1x120xf32> to vector<15x120xf32>
    %139 = arith.mulf %137, %138 : vector<15x120xf32>
    %140 = arith.addf %133, %139 : vector<15x120xf32>
    %141 = vector.extract_strided_slice %68 {offsets = [3, 0], sizes = [15, 128], strides = [1, 1]} : vector<18x128xf32> to vector<15x128xf32>
    %c0_122 = arith.constant 0 : index
    %c2_123 = arith.constant 2 : index
    %c0_124 = arith.constant 0 : index
    %c0_125 = arith.constant 0 : index
    %142 = vector.load %arg1[%c0_122, %c2_123, %c0_124, %c0_125] : memref<2x3x5x120xf32, #tpu.memory_space<vmem>>, vector<1x1x1x120xf32>
    %143 = vector.shape_cast %142 : vector<1x1x1x120xf32> to vector<120xf32>
    %144 = vector.shape_cast %143 : vector<120xf32> to vector<1x120xf32>
    %145 = vector.extract_strided_slice %141 {offsets = [0, 0], sizes = [15, 120], strides = [1, 1]} : vector<15x128xf32> to vector<15x120xf32>
    %146 = vector.broadcast %144 : vector<1x120xf32> to vector<15x120xf32>
    %147 = arith.mulf %145, %146 : vector<15x120xf32>
    %148 = arith.addf %104, %147 : vector<15x120xf32>
    %c0_126 = arith.constant 0 : index
    %c2_127 = arith.constant 2 : index
    %c1_128 = arith.constant 1 : index
    %c0_129 = arith.constant 0 : index
    %149 = vector.load %arg1[%c0_126, %c2_127, %c1_128, %c0_129] : memref<2x3x5x120xf32, #tpu.memory_space<vmem>>, vector<1x1x1x120xf32>
    %150 = vector.shape_cast %149 : vector<1x1x1x120xf32> to vector<120xf32>
    %151 = vector.shape_cast %150 : vector<120xf32> to vector<1x120xf32>
    %152 = vector.extract_strided_slice %141 {offsets = [0, 1], sizes = [15, 120], strides = [1, 1]} : vector<15x128xf32> to vector<15x120xf32>
    %153 = vector.broadcast %151 : vector<1x120xf32> to vector<15x120xf32>
    %154 = arith.mulf %152, %153 : vector<15x120xf32>
    %155 = arith.addf %148, %154 : vector<15x120xf32>
    %c0_130 = arith.constant 0 : index
    %c2_131 = arith.constant 2 : index
    %c2_132 = arith.constant 2 : index
    %c0_133 = arith.constant 0 : index
    %156 = vector.load %arg1[%c0_130, %c2_131, %c2_132, %c0_133] : memref<2x3x5x120xf32, #tpu.memory_space<vmem>>, vector<1x1x1x120xf32>
    %157 = vector.shape_cast %156 : vector<1x1x1x120xf32> to vector<120xf32>
    %158 = vector.shape_cast %157 : vector<120xf32> to vector<1x120xf32>
    %159 = vector.extract_strided_slice %141 {offsets = [0, 2], sizes = [15, 120], strides = [1, 1]} : vector<15x128xf32> to vector<15x120xf32>
    %160 = vector.broadcast %158 : vector<1x120xf32> to vector<15x120xf32>
    %161 = arith.mulf %159, %160 : vector<15x120xf32>
    %162 = arith.addf %155, %161 : vector<15x120xf32>
    %c0_134 = arith.constant 0 : index
    %c2_135 = arith.constant 2 : index
    %c3_136 = arith.constant 3 : index
    %c0_137 = arith.constant 0 : index
    %163 = vector.load %arg1[%c0_134, %c2_135, %c3_136, %c0_137] : memref<2x3x5x120xf32, #tpu.memory_space<vmem>>, vector<1x1x1x120xf32>
    %164 = vector.shape_cast %163 : vector<1x1x1x120xf32> to vector<120xf32>
    %165 = vector.shape_cast %164 : vector<120xf32> to vector<1x120xf32>
    %166 = vector.extract_strided_slice %141 {offsets = [0, 3], sizes = [15, 120], strides = [1, 1]} : vector<15x128xf32> to vector<15x120xf32>
    %167 = vector.broadcast %165 : vector<1x120xf32> to vector<15x120xf32>
    %168 = arith.mulf %166, %167 : vector<15x120xf32>
    %169 = arith.addf %162, %168 : vector<15x120xf32>
    %c0_138 = arith.constant 0 : index
    %c2_139 = arith.constant 2 : index
    %c4_140 = arith.constant 4 : index
    %c0_141 = arith.constant 0 : index
    %170 = vector.load %arg1[%c0_138, %c2_139, %c4_140, %c0_141] : memref<2x3x5x120xf32, #tpu.memory_space<vmem>>, vector<1x1x1x120xf32>
    %171 = vector.shape_cast %170 : vector<1x1x1x120xf32> to vector<120xf32>
    %172 = vector.shape_cast %171 : vector<120xf32> to vector<1x120xf32>
    %173 = vector.extract_strided_slice %141 {offsets = [0, 4], sizes = [15, 120], strides = [1, 1]} : vector<15x128xf32> to vector<15x120xf32>
    %174 = vector.broadcast %172 : vector<1x120xf32> to vector<15x120xf32>
    %175 = arith.mulf %173, %174 : vector<15x120xf32>
    %176 = arith.addf %169, %175 : vector<15x120xf32>
    %c1_142 = arith.constant 1 : index
    %c0_143 = arith.constant 0 : index
    %c0_144 = arith.constant 0 : index
    %177 = vector.load %arg5[%c1_142, %c0_143, %c0_144] : memref<2x18x128xf32, #tpu.memory_space<vmem>>, vector<1x18x128xf32>
    %178 = vector.shape_cast %177 : vector<1x18x128xf32> to vector<18x128xf32>
    %179 = vector.extract_strided_slice %178 {offsets = [0, 0], sizes = [15, 128], strides = [1, 1]} : vector<18x128xf32> to vector<15x128xf32>
    %c1_145 = arith.constant 1 : index
    %c0_146 = arith.constant 0 : index
    %c0_147 = arith.constant 0 : index
    %c0_148 = arith.constant 0 : index
    %180 = vector.load %arg1[%c1_145, %c0_146, %c0_147, %c0_148] : memref<2x3x5x120xf32, #tpu.memory_space<vmem>>, vector<1x1x1x120xf32>
    %181 = vector.shape_cast %180 : vector<1x1x1x120xf32> to vector<120xf32>
    %182 = vector.shape_cast %181 : vector<120xf32> to vector<1x120xf32>
    %183 = vector.extract_strided_slice %179 {offsets = [0, 0], sizes = [15, 120], strides = [1, 1]} : vector<15x128xf32> to vector<15x120xf32>
    %184 = vector.broadcast %182 : vector<1x120xf32> to vector<15x120xf32>
    %185 = arith.mulf %183, %184 : vector<15x120xf32>
    %186 = arith.addf %176, %185 : vector<15x120xf32>
    %c1_149 = arith.constant 1 : index
    %c0_150 = arith.constant 0 : index
    %c1_151 = arith.constant 1 : index
    %c0_152 = arith.constant 0 : index
    %187 = vector.load %arg1[%c1_149, %c0_150, %c1_151, %c0_152] : memref<2x3x5x120xf32, #tpu.memory_space<vmem>>, vector<1x1x1x120xf32>
    %188 = vector.shape_cast %187 : vector<1x1x1x120xf32> to vector<120xf32>
    %189 = vector.shape_cast %188 : vector<120xf32> to vector<1x120xf32>
    %190 = vector.extract_strided_slice %179 {offsets = [0, 1], sizes = [15, 120], strides = [1, 1]} : vector<15x128xf32> to vector<15x120xf32>
    %191 = vector.broadcast %189 : vector<1x120xf32> to vector<15x120xf32>
    %192 = arith.mulf %190, %191 : vector<15x120xf32>
    %193 = arith.addf %186, %192 : vector<15x120xf32>
    %c1_153 = arith.constant 1 : index
    %c0_154 = arith.constant 0 : index
    %c2_155 = arith.constant 2 : index
    %c0_156 = arith.constant 0 : index
    %194 = vector.load %arg1[%c1_153, %c0_154, %c2_155, %c0_156] : memref<2x3x5x120xf32, #tpu.memory_space<vmem>>, vector<1x1x1x120xf32>
    %195 = vector.shape_cast %194 : vector<1x1x1x120xf32> to vector<120xf32>
    %196 = vector.shape_cast %195 : vector<120xf32> to vector<1x120xf32>
    %197 = vector.extract_strided_slice %179 {offsets = [0, 2], sizes = [15, 120], strides = [1, 1]} : vector<15x128xf32> to vector<15x120xf32>
    %198 = vector.broadcast %196 : vector<1x120xf32> to vector<15x120xf32>
    %199 = arith.mulf %197, %198 : vector<15x120xf32>
    %200 = arith.addf %193, %199 : vector<15x120xf32>
    %c1_157 = arith.constant 1 : index
    %c0_158 = arith.constant 0 : index
    %c3_159 = arith.constant 3 : index
    %c0_160 = arith.constant 0 : index
    %201 = vector.load %arg1[%c1_157, %c0_158, %c3_159, %c0_160] : memref<2x3x5x120xf32, #tpu.memory_space<vmem>>, vector<1x1x1x120xf32>
    %202 = vector.shape_cast %201 : vector<1x1x1x120xf32> to vector<120xf32>
    %203 = vector.shape_cast %202 : vector<120xf32> to vector<1x120xf32>
    %204 = vector.extract_strided_slice %179 {offsets = [0, 3], sizes = [15, 120], strides = [1, 1]} : vector<15x128xf32> to vector<15x120xf32>
    %205 = vector.broadcast %203 : vector<1x120xf32> to vector<15x120xf32>
    %206 = arith.mulf %204, %205 : vector<15x120xf32>
    %207 = arith.addf %200, %206 : vector<15x120xf32>
    %c1_161 = arith.constant 1 : index
    %c0_162 = arith.constant 0 : index
    %c4_163 = arith.constant 4 : index
    %c0_164 = arith.constant 0 : index
    %208 = vector.load %arg1[%c1_161, %c0_162, %c4_163, %c0_164] : memref<2x3x5x120xf32, #tpu.memory_space<vmem>>, vector<1x1x1x120xf32>
    %209 = vector.shape_cast %208 : vector<1x1x1x120xf32> to vector<120xf32>
    %210 = vector.shape_cast %209 : vector<120xf32> to vector<1x120xf32>
    %211 = vector.extract_strided_slice %179 {offsets = [0, 4], sizes = [15, 120], strides = [1, 1]} : vector<15x128xf32> to vector<15x120xf32>
    %212 = vector.broadcast %210 : vector<1x120xf32> to vector<15x120xf32>
    %213 = arith.mulf %211, %212 : vector<15x120xf32>
    %214 = arith.addf %207, %213 : vector<15x120xf32>
    %215 = vector.extract_strided_slice %178 {offsets = [2, 0], sizes = [15, 128], strides = [1, 1]} : vector<18x128xf32> to vector<15x128xf32>
    %c1_165 = arith.constant 1 : index
    %c1_166 = arith.constant 1 : index
    %c0_167 = arith.constant 0 : index
    %c0_168 = arith.constant 0 : index
    %216 = vector.load %arg1[%c1_165, %c1_166, %c0_167, %c0_168] : memref<2x3x5x120xf32, #tpu.memory_space<vmem>>, vector<1x1x1x120xf32>
    %217 = vector.shape_cast %216 : vector<1x1x1x120xf32> to vector<120xf32>
    %218 = vector.shape_cast %217 : vector<120xf32> to vector<1x120xf32>
    %219 = vector.extract_strided_slice %215 {offsets = [0, 0], sizes = [15, 120], strides = [1, 1]} : vector<15x128xf32> to vector<15x120xf32>
    %220 = vector.broadcast %218 : vector<1x120xf32> to vector<15x120xf32>
    %221 = arith.mulf %219, %220 : vector<15x120xf32>
    %222 = arith.addf %140, %221 : vector<15x120xf32>
    %c1_169 = arith.constant 1 : index
    %c1_170 = arith.constant 1 : index
    %c1_171 = arith.constant 1 : index
    %c0_172 = arith.constant 0 : index
    %223 = vector.load %arg1[%c1_169, %c1_170, %c1_171, %c0_172] : memref<2x3x5x120xf32, #tpu.memory_space<vmem>>, vector<1x1x1x120xf32>
    %224 = vector.shape_cast %223 : vector<1x1x1x120xf32> to vector<120xf32>
    %225 = vector.shape_cast %224 : vector<120xf32> to vector<1x120xf32>
    %226 = vector.extract_strided_slice %215 {offsets = [0, 1], sizes = [15, 120], strides = [1, 1]} : vector<15x128xf32> to vector<15x120xf32>
    %227 = vector.broadcast %225 : vector<1x120xf32> to vector<15x120xf32>
    %228 = arith.mulf %226, %227 : vector<15x120xf32>
    %229 = arith.addf %222, %228 : vector<15x120xf32>
    %c1_173 = arith.constant 1 : index
    %c1_174 = arith.constant 1 : index
    %c2_175 = arith.constant 2 : index
    %c0_176 = arith.constant 0 : index
    %230 = vector.load %arg1[%c1_173, %c1_174, %c2_175, %c0_176] : memref<2x3x5x120xf32, #tpu.memory_space<vmem>>, vector<1x1x1x120xf32>
    %231 = vector.shape_cast %230 : vector<1x1x1x120xf32> to vector<120xf32>
    %232 = vector.shape_cast %231 : vector<120xf32> to vector<1x120xf32>
    %233 = vector.extract_strided_slice %215 {offsets = [0, 2], sizes = [15, 120], strides = [1, 1]} : vector<15x128xf32> to vector<15x120xf32>
    %234 = vector.broadcast %232 : vector<1x120xf32> to vector<15x120xf32>
    %235 = arith.mulf %233, %234 : vector<15x120xf32>
    %236 = arith.addf %229, %235 : vector<15x120xf32>
    %c1_177 = arith.constant 1 : index
    %c1_178 = arith.constant 1 : index
    %c3_179 = arith.constant 3 : index
    %c0_180 = arith.constant 0 : index
    %237 = vector.load %arg1[%c1_177, %c1_178, %c3_179, %c0_180] : memref<2x3x5x120xf32, #tpu.memory_space<vmem>>, vector<1x1x1x120xf32>
    %238 = vector.shape_cast %237 : vector<1x1x1x120xf32> to vector<120xf32>
    %239 = vector.shape_cast %238 : vector<120xf32> to vector<1x120xf32>
    %240 = vector.extract_strided_slice %215 {offsets = [0, 3], sizes = [15, 120], strides = [1, 1]} : vector<15x128xf32> to vector<15x120xf32>
    %241 = vector.broadcast %239 : vector<1x120xf32> to vector<15x120xf32>
    %242 = arith.mulf %240, %241 : vector<15x120xf32>
    %243 = arith.addf %236, %242 : vector<15x120xf32>
    %c1_181 = arith.constant 1 : index
    %c1_182 = arith.constant 1 : index
    %c4_183 = arith.constant 4 : index
    %c0_184 = arith.constant 0 : index
    %244 = vector.load %arg1[%c1_181, %c1_182, %c4_183, %c0_184] : memref<2x3x5x120xf32, #tpu.memory_space<vmem>>, vector<1x1x1x120xf32>
    %245 = vector.shape_cast %244 : vector<1x1x1x120xf32> to vector<120xf32>
    %246 = vector.shape_cast %245 : vector<120xf32> to vector<1x120xf32>
    %247 = vector.extract_strided_slice %215 {offsets = [0, 4], sizes = [15, 120], strides = [1, 1]} : vector<15x128xf32> to vector<15x120xf32>
    %248 = vector.broadcast %246 : vector<1x120xf32> to vector<15x120xf32>
    %249 = arith.mulf %247, %248 : vector<15x120xf32>
    %250 = arith.addf %243, %249 : vector<15x120xf32>
    %251 = vector.extract_strided_slice %178 {offsets = [3, 0], sizes = [15, 128], strides = [1, 1]} : vector<18x128xf32> to vector<15x128xf32>
    %c1_185 = arith.constant 1 : index
    %c2_186 = arith.constant 2 : index
    %c0_187 = arith.constant 0 : index
    %c0_188 = arith.constant 0 : index
    %252 = vector.load %arg1[%c1_185, %c2_186, %c0_187, %c0_188] : memref<2x3x5x120xf32, #tpu.memory_space<vmem>>, vector<1x1x1x120xf32>
    %253 = vector.shape_cast %252 : vector<1x1x1x120xf32> to vector<120xf32>
    %254 = vector.shape_cast %253 : vector<120xf32> to vector<1x120xf32>
    %255 = vector.extract_strided_slice %251 {offsets = [0, 0], sizes = [15, 120], strides = [1, 1]} : vector<15x128xf32> to vector<15x120xf32>
    %256 = vector.broadcast %254 : vector<1x120xf32> to vector<15x120xf32>
    %257 = arith.mulf %255, %256 : vector<15x120xf32>
    %258 = arith.addf %214, %257 : vector<15x120xf32>
    %c1_189 = arith.constant 1 : index
    %c2_190 = arith.constant 2 : index
    %c1_191 = arith.constant 1 : index
    %c0_192 = arith.constant 0 : index
    %259 = vector.load %arg1[%c1_189, %c2_190, %c1_191, %c0_192] : memref<2x3x5x120xf32, #tpu.memory_space<vmem>>, vector<1x1x1x120xf32>
    %260 = vector.shape_cast %259 : vector<1x1x1x120xf32> to vector<120xf32>
    %261 = vector.shape_cast %260 : vector<120xf32> to vector<1x120xf32>
    %262 = vector.extract_strided_slice %251 {offsets = [0, 1], sizes = [15, 120], strides = [1, 1]} : vector<15x128xf32> to vector<15x120xf32>
    %263 = vector.broadcast %261 : vector<1x120xf32> to vector<15x120xf32>
    %264 = arith.mulf %262, %263 : vector<15x120xf32>
    %265 = arith.addf %258, %264 : vector<15x120xf32>
    %c1_193 = arith.constant 1 : index
    %c2_194 = arith.constant 2 : index
    %c2_195 = arith.constant 2 : index
    %c0_196 = arith.constant 0 : index
    %266 = vector.load %arg1[%c1_193, %c2_194, %c2_195, %c0_196] : memref<2x3x5x120xf32, #tpu.memory_space<vmem>>, vector<1x1x1x120xf32>
    %267 = vector.shape_cast %266 : vector<1x1x1x120xf32> to vector<120xf32>
    %268 = vector.shape_cast %267 : vector<120xf32> to vector<1x120xf32>
    %269 = vector.extract_strided_slice %251 {offsets = [0, 2], sizes = [15, 120], strides = [1, 1]} : vector<15x128xf32> to vector<15x120xf32>
    %270 = vector.broadcast %268 : vector<1x120xf32> to vector<15x120xf32>
    %271 = arith.mulf %269, %270 : vector<15x120xf32>
    %272 = arith.addf %265, %271 : vector<15x120xf32>
    %c1_197 = arith.constant 1 : index
    %c2_198 = arith.constant 2 : index
    %c3_199 = arith.constant 3 : index
    %c0_200 = arith.constant 0 : index
    %273 = vector.load %arg1[%c1_197, %c2_198, %c3_199, %c0_200] : memref<2x3x5x120xf32, #tpu.memory_space<vmem>>, vector<1x1x1x120xf32>
    %274 = vector.shape_cast %273 : vector<1x1x1x120xf32> to vector<120xf32>
    %275 = vector.shape_cast %274 : vector<120xf32> to vector<1x120xf32>
    %276 = vector.extract_strided_slice %251 {offsets = [0, 3], sizes = [15, 120], strides = [1, 1]} : vector<15x128xf32> to vector<15x120xf32>
    %277 = vector.broadcast %275 : vector<1x120xf32> to vector<15x120xf32>
    %278 = arith.mulf %276, %277 : vector<15x120xf32>
    %279 = arith.addf %272, %278 : vector<15x120xf32>
    %c1_201 = arith.constant 1 : index
    %c2_202 = arith.constant 2 : index
    %c4_203 = arith.constant 4 : index
    %c0_204 = arith.constant 0 : index
    %280 = vector.load %arg1[%c1_201, %c2_202, %c4_203, %c0_204] : memref<2x3x5x120xf32, #tpu.memory_space<vmem>>, vector<1x1x1x120xf32>
    %281 = vector.shape_cast %280 : vector<1x1x1x120xf32> to vector<120xf32>
    %282 = vector.shape_cast %281 : vector<120xf32> to vector<1x120xf32>
    %283 = vector.extract_strided_slice %251 {offsets = [0, 4], sizes = [15, 120], strides = [1, 1]} : vector<15x128xf32> to vector<15x120xf32>
    %284 = vector.broadcast %282 : vector<1x120xf32> to vector<15x120xf32>
    %285 = arith.mulf %283, %284 : vector<15x120xf32>
    %286 = arith.addf %279, %285 : vector<15x120xf32>
    %c0_205 = arith.constant 0 : index
    %c0_206 = arith.constant 0 : index
    %c0_207 = arith.constant 0 : index
    %c0_208 = arith.constant 0 : index
    %287 = vector.load %arg4[%c0_205, %c0_206, %c0_207, %c0_208] : memref<2x2x15x120xf32, #tpu.memory_space<vmem>>, vector<1x1x15x120xf32>
    %288 = vector.shape_cast %287 : vector<1x1x15x120xf32> to vector<15x120xf32>
    %289 = vector.shape_cast %286 : vector<15x120xf32> to vector<1x1x15x120xf32>
    tpu.vector_store %arg4[%c0_205, %c0_206, %c0_207, %c0_208], %289 {strides = array<i32>} : memref<2x2x15x120xf32, #tpu.memory_space<vmem>>, vector<1x1x15x120xf32>,
    %c0_209 = arith.constant 0 : index
    %c1_210 = arith.constant 1 : index
    %c0_211 = arith.constant 0 : index
    %c0_212 = arith.constant 0 : index
    %290 = vector.load %arg4[%c0_209, %c1_210, %c0_211, %c0_212] : memref<2x2x15x120xf32, #tpu.memory_space<vmem>>, vector<1x1x15x120xf32>
    %291 = vector.shape_cast %290 : vector<1x1x15x120xf32> to vector<15x120xf32>
    %292 = vector.shape_cast %250 : vector<15x120xf32> to vector<1x1x15x120xf32>
    tpu.vector_store %arg4[%c0_209, %c1_210, %c0_211, %c0_212], %292 {strides = array<i32>} : memref<2x2x15x120xf32, #tpu.memory_space<vmem>>, vector<1x1x15x120xf32>,
    %c1_213 = arith.constant 1 : index
    %c0_214 = arith.constant 0 : index
    %c0_215 = arith.constant 0 : index
    %c0_216 = arith.constant 0 : index
    %293 = vector.load %arg3[%c1_213, %c0_214, %c0_215, %c0_216] : memref<2x4x16x16xf32, #tpu.memory_space<vmem>>, vector<1x1x16x16xf32>
    %294 = vector.shape_cast %293 : vector<1x1x16x16xf32> to vector<16x16xf32>
    %c0_217 = arith.constant 0 : index
    %c1_218 = arith.constant 1 : index
    %c2_219 = arith.constant 2 : index
    %295 = vector.load %arg5[%c0_217, %c1_218, %c2_219] : memref<2x18x128xf32, #tpu.memory_space<vmem>>, vector<1x16x16xf32>
    %296 = vector.shape_cast %295 : vector<1x16x16xf32> to vector<16x16xf32>
    %297 = vector.shape_cast %294 : vector<16x16xf32> to vector<1x16x16xf32>
    tpu.vector_store %arg5[%c0_217, %c1_218, %c2_219], %297 {strides = array<i32>} : memref<2x18x128xf32, #tpu.memory_space<vmem>>, vector<1x16x16xf32>,
    %c1_220 = arith.constant 1 : index
    %c0_221 = arith.constant 0 : index
    %c0_222 = arith.constant 0 : index
    %c0_223 = arith.constant 0 : index
    %298 = vector.load %arg3[%c1_220, %c0_221, %c0_222, %c0_223] : memref<2x4x16x16xf32, #tpu.memory_space<vmem>>, vector<1x1x16x16xf32>
    %299 = vector.shape_cast %298 : vector<1x1x16x16xf32> to vector<16x16xf32>
    %c0_224 = arith.constant 0 : index
    %c1_225 = arith.constant 1 : index
    %c22_226 = arith.constant 22 : index
    %300 = vector.load %arg5[%c0_224, %c1_225, %c22_226] : memref<2x18x128xf32, #tpu.memory_space<vmem>>, vector<1x16x16xf32>
    %301 = vector.shape_cast %300 : vector<1x16x16xf32> to vector<16x16xf32>
    %302 = vector.shape_cast %299 : vector<16x16xf32> to vector<1x16x16xf32>
    tpu.vector_store %arg5[%c0_224, %c1_225, %c22_226], %302 {strides = array<i32>} : memref<2x18x128xf32, #tpu.memory_space<vmem>>, vector<1x16x16xf32>,
    %c1_227 = arith.constant 1 : index
    %c0_228 = arith.constant 0 : index
    %c0_229 = arith.constant 0 : index
    %c0_230 = arith.constant 0 : index
    %303 = vector.load %arg3[%c1_227, %c0_228, %c0_229, %c0_230] : memref<2x4x16x16xf32, #tpu.memory_space<vmem>>, vector<1x1x16x16xf32>
    %304 = vector.shape_cast %303 : vector<1x1x16x16xf32> to vector<16x16xf32>
    %c0_231 = arith.constant 0 : index
    %c1_232 = arith.constant 1 : index
    %c42_233 = arith.constant 42 : index
    %305 = vector.load %arg5[%c0_231, %c1_232, %c42_233] : memref<2x18x128xf32, #tpu.memory_space<vmem>>, vector<1x16x16xf32>
    %306 = vector.shape_cast %305 : vector<1x16x16xf32> to vector<16x16xf32>
    %307 = vector.shape_cast %304 : vector<16x16xf32> to vector<1x16x16xf32>
    tpu.vector_store %arg5[%c0_231, %c1_232, %c42_233], %307 {strides = array<i32>} : memref<2x18x128xf32, #tpu.memory_space<vmem>>, vector<1x16x16xf32>,
    %c1_234 = arith.constant 1 : index
    %c2_235 = arith.constant 2 : index
    %c0_236 = arith.constant 0 : index
    %c0_237 = arith.constant 0 : index
    %308 = vector.load %arg3[%c1_234, %c2_235, %c0_236, %c0_237] : memref<2x4x16x16xf32, #tpu.memory_space<vmem>>, vector<1x1x16x16xf32>
    %309 = vector.shape_cast %308 : vector<1x1x16x16xf32> to vector<16x16xf32>
    %c0_238 = arith.constant 0 : index
    %c1_239 = arith.constant 1 : index
    %c62_240 = arith.constant 62 : index
    %310 = vector.load %arg5[%c0_238, %c1_239, %c62_240] : memref<2x18x128xf32, #tpu.memory_space<vmem>>, vector<1x16x16xf32>
    %311 = vector.shape_cast %310 : vector<1x16x16xf32> to vector<16x16xf32>
    %312 = vector.shape_cast %309 : vector<16x16xf32> to vector<1x16x16xf32>
    tpu.vector_store %arg5[%c0_238, %c1_239, %c62_240], %312 {strides = array<i32>} : memref<2x18x128xf32, #tpu.memory_space<vmem>>, vector<1x16x16xf32>,
    %c1_241 = arith.constant 1 : index
    %c2_242 = arith.constant 2 : index
    %c0_243 = arith.constant 0 : index
    %c0_244 = arith.constant 0 : index
    %313 = vector.load %arg3[%c1_241, %c2_242, %c0_243, %c0_244] : memref<2x4x16x16xf32, #tpu.memory_space<vmem>>, vector<1x1x16x16xf32>
    %314 = vector.shape_cast %313 : vector<1x1x16x16xf32> to vector<16x16xf32>
    %c0_245 = arith.constant 0 : index
    %c1_246 = arith.constant 1 : index
    %c82_247 = arith.constant 82 : index
    %315 = vector.load %arg5[%c0_245, %c1_246, %c82_247] : memref<2x18x128xf32, #tpu.memory_space<vmem>>, vector<1x16x16xf32>
    %316 = vector.shape_cast %315 : vector<1x16x16xf32> to vector<16x16xf32>
    %317 = vector.shape_cast %314 : vector<16x16xf32> to vector<1x16x16xf32>
    tpu.vector_store %arg5[%c0_245, %c1_246, %c82_247], %317 {strides = array<i32>} : memref<2x18x128xf32, #tpu.memory_space<vmem>>, vector<1x16x16xf32>,
    %c1_248 = arith.constant 1 : index
    %c2_249 = arith.constant 2 : index
    %c0_250 = arith.constant 0 : index
    %c0_251 = arith.constant 0 : index
    %318 = vector.load %arg3[%c1_248, %c2_249, %c0_250, %c0_251] : memref<2x4x16x16xf32, #tpu.memory_space<vmem>>, vector<1x1x16x16xf32>
    %319 = vector.shape_cast %318 : vector<1x1x16x16xf32> to vector<16x16xf32>
    %c0_252 = arith.constant 0 : index
    %c1_253 = arith.constant 1 : index
    %c102_254 = arith.constant 102 : index
    %320 = vector.load %arg5[%c0_252, %c1_253, %c102_254] : memref<2x18x128xf32, #tpu.memory_space<vmem>>, vector<1x16x16xf32>
    %321 = vector.shape_cast %320 : vector<1x16x16xf32> to vector<16x16xf32>
    %322 = vector.shape_cast %319 : vector<16x16xf32> to vector<1x16x16xf32>
    tpu.vector_store %arg5[%c0_252, %c1_253, %c102_254], %322 {strides = array<i32>} : memref<2x18x128xf32, #tpu.memory_space<vmem>>, vector<1x16x16xf32>,
    %c1_255 = arith.constant 1 : index
    %c1_256 = arith.constant 1 : index
    %c0_257 = arith.constant 0 : index
    %c0_258 = arith.constant 0 : index
    %323 = vector.load %arg3[%c1_255, %c1_256, %c0_257, %c0_258] : memref<2x4x16x16xf32, #tpu.memory_space<vmem>>, vector<1x1x16x16xf32>
    %324 = vector.shape_cast %323 : vector<1x1x16x16xf32> to vector<16x16xf32>
    %c1_259 = arith.constant 1 : index
    %c1_260 = arith.constant 1 : index
    %c2_261 = arith.constant 2 : index
    %325 = vector.load %arg5[%c1_259, %c1_260, %c2_261] : memref<2x18x128xf32, #tpu.memory_space<vmem>>, vector<1x16x16xf32>
    %326 = vector.shape_cast %325 : vector<1x16x16xf32> to vector<16x16xf32>
    %327 = vector.shape_cast %324 : vector<16x16xf32> to vector<1x16x16xf32>
    tpu.vector_store %arg5[%c1_259, %c1_260, %c2_261], %327 {strides = array<i32>} : memref<2x18x128xf32, #tpu.memory_space<vmem>>, vector<1x16x16xf32>,
    %c1_262 = arith.constant 1 : index
    %c1_263 = arith.constant 1 : index
    %c0_264 = arith.constant 0 : index
    %c0_265 = arith.constant 0 : index
    %328 = vector.load %arg3[%c1_262, %c1_263, %c0_264, %c0_265] : memref<2x4x16x16xf32, #tpu.memory_space<vmem>>, vector<1x1x16x16xf32>
    %329 = vector.shape_cast %328 : vector<1x1x16x16xf32> to vector<16x16xf32>
    %c1_266 = arith.constant 1 : index
    %c1_267 = arith.constant 1 : index
    %c22_268 = arith.constant 22 : index
    %330 = vector.load %arg5[%c1_266, %c1_267, %c22_268] : memref<2x18x128xf32, #tpu.memory_space<vmem>>, vector<1x16x16xf32>
    %331 = vector.shape_cast %330 : vector<1x16x16xf32> to vector<16x16xf32>
    %332 = vector.shape_cast %329 : vector<16x16xf32> to vector<1x16x16xf32>
    tpu.vector_store %arg5[%c1_266, %c1_267, %c22_268], %332 {strides = array<i32>} : memref<2x18x128xf32, #tpu.memory_space<vmem>>, vector<1x16x16xf32>,
    %c1_269 = arith.constant 1 : index
    %c1_270 = arith.constant 1 : index
    %c0_271 = arith.constant 0 : index
    %c0_272 = arith.constant 0 : index
    %333 = vector.load %arg3[%c1_269, %c1_270, %c0_271, %c0_272] : memref<2x4x16x16xf32, #tpu.memory_space<vmem>>, vector<1x1x16x16xf32>
    %334 = vector.shape_cast %333 : vector<1x1x16x16xf32> to vector<16x16xf32>
    %c1_273 = arith.constant 1 : index
    %c1_274 = arith.constant 1 : index
    %c42_275 = arith.constant 42 : index
    %335 = vector.load %arg5[%c1_273, %c1_274, %c42_275] : memref<2x18x128xf32, #tpu.memory_space<vmem>>, vector<1x16x16xf32>
    %336 = vector.shape_cast %335 : vector<1x16x16xf32> to vector<16x16xf32>
    %337 = vector.shape_cast %334 : vector<16x16xf32> to vector<1x16x16xf32>
    tpu.vector_store %arg5[%c1_273, %c1_274, %c42_275], %337 {strides = array<i32>} : memref<2x18x128xf32, #tpu.memory_space<vmem>>, vector<1x16x16xf32>,
    %c1_276 = arith.constant 1 : index
    %c3_277 = arith.constant 3 : index
    %c0_278 = arith.constant 0 : index
    %c0_279 = arith.constant 0 : index
    %338 = vector.load %arg3[%c1_276, %c3_277, %c0_278, %c0_279] : memref<2x4x16x16xf32, #tpu.memory_space<vmem>>, vector<1x1x16x16xf32>
    %339 = vector.shape_cast %338 : vector<1x1x16x16xf32> to vector<16x16xf32>
    %c1_280 = arith.constant 1 : index
    %c1_281 = arith.constant 1 : index
    %c62_282 = arith.constant 62 : index
    %340 = vector.load %arg5[%c1_280, %c1_281, %c62_282] : memref<2x18x128xf32, #tpu.memory_space<vmem>>, vector<1x16x16xf32>
    %341 = vector.shape_cast %340 : vector<1x16x16xf32> to vector<16x16xf32>
    %342 = vector.shape_cast %339 : vector<16x16xf32> to vector<1x16x16xf32>
    tpu.vector_store %arg5[%c1_280, %c1_281, %c62_282], %342 {strides = array<i32>} : memref<2x18x128xf32, #tpu.memory_space<vmem>>, vector<1x16x16xf32>,
    %c1_283 = arith.constant 1 : index
    %c3_284 = arith.constant 3 : index
    %c0_285 = arith.constant 0 : index
    %c0_286 = arith.constant 0 : index
    %343 = vector.load %arg3[%c1_283, %c3_284, %c0_285, %c0_286] : memref<2x4x16x16xf32, #tpu.memory_space<vmem>>, vector<1x1x16x16xf32>
    %344 = vector.shape_cast %343 : vector<1x1x16x16xf32> to vector<16x16xf32>
    %c1_287 = arith.constant 1 : index
    %c1_288 = arith.constant 1 : index
    %c82_289 = arith.constant 82 : index
    %345 = vector.load %arg5[%c1_287, %c1_288, %c82_289] : memref<2x18x128xf32, #tpu.memory_space<vmem>>, vector<1x16x16xf32>
    %346 = vector.shape_cast %345 : vector<1x16x16xf32> to vector<16x16xf32>
    %347 = vector.shape_cast %344 : vector<16x16xf32> to vector<1x16x16xf32>
    tpu.vector_store %arg5[%c1_287, %c1_288, %c82_289], %347 {strides = array<i32>} : memref<2x18x128xf32, #tpu.memory_space<vmem>>, vector<1x16x16xf32>,
    %c1_290 = arith.constant 1 : index
    %c3_291 = arith.constant 3 : index
    %c0_292 = arith.constant 0 : index
    %c0_293 = arith.constant 0 : index
    %348 = vector.load %arg3[%c1_290, %c3_291, %c0_292, %c0_293] : memref<2x4x16x16xf32, #tpu.memory_space<vmem>>, vector<1x1x16x16xf32>
    %349 = vector.shape_cast %348 : vector<1x1x16x16xf32> to vector<16x16xf32>
    %c1_294 = arith.constant 1 : index
    %c1_295 = arith.constant 1 : index
    %c102_296 = arith.constant 102 : index
    %350 = vector.load %arg5[%c1_294, %c1_295, %c102_296] : memref<2x18x128xf32, #tpu.memory_space<vmem>>, vector<1x16x16xf32>
    %351 = vector.shape_cast %350 : vector<1x16x16xf32> to vector<16x16xf32>
    %352 = vector.shape_cast %349 : vector<16x16xf32> to vector<1x16x16xf32>
    tpu.vector_store %arg5[%c1_294, %c1_295, %c102_296], %352 {strides = array<i32>} : memref<2x18x128xf32, #tpu.memory_space<vmem>>, vector<1x16x16xf32>,
    %c0_297 = arith.constant 0 : index
    %c0_298 = arith.constant 0 : index
    %353 = vector.load %arg2[%c0_297, %c0_298] : memref<1x120xf32, #tpu.memory_space<vmem>>, vector<1x120xf32>
    %354 = vector.shape_cast %353 : vector<1x120xf32> to vector<1x120xf32>
    %355 = vector.broadcast %354 : vector<1x120xf32> to vector<15x120xf32>
    %356 = vector.shape_cast %353 : vector<1x120xf32> to vector<1x120xf32>
    %357 = vector.broadcast %356 : vector<1x120xf32> to vector<15x120xf32>
    %c0_299 = arith.constant 0 : index
    %c0_300 = arith.constant 0 : index
    %c0_301 = arith.constant 0 : index
    %358 = vector.load %arg5[%c0_299, %c0_300, %c0_301] : memref<2x18x128xf32, #tpu.memory_space<vmem>>, vector<1x18x128xf32>
    %359 = vector.shape_cast %358 : vector<1x18x128xf32> to vector<18x128xf32>
    %360 = vector.extract_strided_slice %359 {offsets = [0, 0], sizes = [15, 128], strides = [1, 1]} : vector<18x128xf32> to vector<15x128xf32>
    %c0_302 = arith.constant 0 : index
    %c0_303 = arith.constant 0 : index
    %c0_304 = arith.constant 0 : index
    %c0_305 = arith.constant 0 : index
    %361 = vector.load %arg1[%c0_302, %c0_303, %c0_304, %c0_305] : memref<2x3x5x120xf32, #tpu.memory_space<vmem>>, vector<1x1x1x120xf32>
    %362 = vector.shape_cast %361 : vector<1x1x1x120xf32> to vector<120xf32>
    %363 = vector.shape_cast %362 : vector<120xf32> to vector<1x120xf32>
    %364 = vector.extract_strided_slice %360 {offsets = [0, 0], sizes = [15, 120], strides = [1, 1]} : vector<15x128xf32> to vector<15x120xf32>
    %365 = vector.broadcast %363 : vector<1x120xf32> to vector<15x120xf32>
    %366 = arith.mulf %364, %365 : vector<15x120xf32>
    %367 = arith.addf %355, %366 : vector<15x120xf32>
    %c0_306 = arith.constant 0 : index
    %c0_307 = arith.constant 0 : index
    %c1_308 = arith.constant 1 : index
    %c0_309 = arith.constant 0 : index
    %368 = vector.load %arg1[%c0_306, %c0_307, %c1_308, %c0_309] : memref<2x3x5x120xf32, #tpu.memory_space<vmem>>, vector<1x1x1x120xf32>
    %369 = vector.shape_cast %368 : vector<1x1x1x120xf32> to vector<120xf32>
    %370 = vector.shape_cast %369 : vector<120xf32> to vector<1x120xf32>
    %371 = vector.extract_strided_slice %360 {offsets = [0, 1], sizes = [15, 120], strides = [1, 1]} : vector<15x128xf32> to vector<15x120xf32>
    %372 = vector.broadcast %370 : vector<1x120xf32> to vector<15x120xf32>
    %373 = arith.mulf %371, %372 : vector<15x120xf32>
    %374 = arith.addf %367, %373 : vector<15x120xf32>
    %c0_310 = arith.constant 0 : index
    %c0_311 = arith.constant 0 : index
    %c2_312 = arith.constant 2 : index
    %c0_313 = arith.constant 0 : index
    %375 = vector.load %arg1[%c0_310, %c0_311, %c2_312, %c0_313] : memref<2x3x5x120xf32, #tpu.memory_space<vmem>>, vector<1x1x1x120xf32>
    %376 = vector.shape_cast %375 : vector<1x1x1x120xf32> to vector<120xf32>
    %377 = vector.shape_cast %376 : vector<120xf32> to vector<1x120xf32>
    %378 = vector.extract_strided_slice %360 {offsets = [0, 2], sizes = [15, 120], strides = [1, 1]} : vector<15x128xf32> to vector<15x120xf32>
    %379 = vector.broadcast %377 : vector<1x120xf32> to vector<15x120xf32>
    %380 = arith.mulf %378, %379 : vector<15x120xf32>
    %381 = arith.addf %374, %380 : vector<15x120xf32>
    %c0_314 = arith.constant 0 : index
    %c0_315 = arith.constant 0 : index
    %c3_316 = arith.constant 3 : index
    %c0_317 = arith.constant 0 : index
    %382 = vector.load %arg1[%c0_314, %c0_315, %c3_316, %c0_317] : memref<2x3x5x120xf32, #tpu.memory_space<vmem>>, vector<1x1x1x120xf32>
    %383 = vector.shape_cast %382 : vector<1x1x1x120xf32> to vector<120xf32>
    %384 = vector.shape_cast %383 : vector<120xf32> to vector<1x120xf32>
    %385 = vector.extract_strided_slice %360 {offsets = [0, 3], sizes = [15, 120], strides = [1, 1]} : vector<15x128xf32> to vector<15x120xf32>
    %386 = vector.broadcast %384 : vector<1x120xf32> to vector<15x120xf32>
    %387 = arith.mulf %385, %386 : vector<15x120xf32>
    %388 = arith.addf %381, %387 : vector<15x120xf32>
    %c0_318 = arith.constant 0 : index
    %c0_319 = arith.constant 0 : index
    %c4_320 = arith.constant 4 : index
    %c0_321 = arith.constant 0 : index
    %389 = vector.load %arg1[%c0_318, %c0_319, %c4_320, %c0_321] : memref<2x3x5x120xf32, #tpu.memory_space<vmem>>, vector<1x1x1x120xf32>
    %390 = vector.shape_cast %389 : vector<1x1x1x120xf32> to vector<120xf32>
    %391 = vector.shape_cast %390 : vector<120xf32> to vector<1x120xf32>
    %392 = vector.extract_strided_slice %360 {offsets = [0, 4], sizes = [15, 120], strides = [1, 1]} : vector<15x128xf32> to vector<15x120xf32>
    %393 = vector.broadcast %391 : vector<1x120xf32> to vector<15x120xf32>
    %394 = arith.mulf %392, %393 : vector<15x120xf32>
    %395 = arith.addf %388, %394 : vector<15x120xf32>
    %396 = vector.extract_strided_slice %359 {offsets = [2, 0], sizes = [15, 128], strides = [1, 1]} : vector<18x128xf32> to vector<15x128xf32>
    %c0_322 = arith.constant 0 : index
    %c1_323 = arith.constant 1 : index
    %c0_324 = arith.constant 0 : index
    %c0_325 = arith.constant 0 : index
    %397 = vector.load %arg1[%c0_322, %c1_323, %c0_324, %c0_325] : memref<2x3x5x120xf32, #tpu.memory_space<vmem>>, vector<1x1x1x120xf32>
    %398 = vector.shape_cast %397 : vector<1x1x1x120xf32> to vector<120xf32>
    %399 = vector.shape_cast %398 : vector<120xf32> to vector<1x120xf32>
    %400 = vector.extract_strided_slice %396 {offsets = [0, 0], sizes = [15, 120], strides = [1, 1]} : vector<15x128xf32> to vector<15x120xf32>
    %401 = vector.broadcast %399 : vector<1x120xf32> to vector<15x120xf32>
    %402 = arith.mulf %400, %401 : vector<15x120xf32>
    %403 = arith.addf %357, %402 : vector<15x120xf32>
    %c0_326 = arith.constant 0 : index
    %c1_327 = arith.constant 1 : index
    %c1_328 = arith.constant 1 : index
    %c0_329 = arith.constant 0 : index
    %404 = vector.load %arg1[%c0_326, %c1_327, %c1_328, %c0_329] : memref<2x3x5x120xf32, #tpu.memory_space<vmem>>, vector<1x1x1x120xf32>
    %405 = vector.shape_cast %404 : vector<1x1x1x120xf32> to vector<120xf32>
    %406 = vector.shape_cast %405 : vector<120xf32> to vector<1x120xf32>
    %407 = vector.extract_strided_slice %396 {offsets = [0, 1], sizes = [15, 120], strides = [1, 1]} : vector<15x128xf32> to vector<15x120xf32>
    %408 = vector.broadcast %406 : vector<1x120xf32> to vector<15x120xf32>
    %409 = arith.mulf %407, %408 : vector<15x120xf32>
    %410 = arith.addf %403, %409 : vector<15x120xf32>
    %c0_330 = arith.constant 0 : index
    %c1_331 = arith.constant 1 : index
    %c2_332 = arith.constant 2 : index
    %c0_333 = arith.constant 0 : index
    %411 = vector.load %arg1[%c0_330, %c1_331, %c2_332, %c0_333] : memref<2x3x5x120xf32, #tpu.memory_space<vmem>>, vector<1x1x1x120xf32>
    %412 = vector.shape_cast %411 : vector<1x1x1x120xf32> to vector<120xf32>
    %413 = vector.shape_cast %412 : vector<120xf32> to vector<1x120xf32>
    %414 = vector.extract_strided_slice %396 {offsets = [0, 2], sizes = [15, 120], strides = [1, 1]} : vector<15x128xf32> to vector<15x120xf32>
    %415 = vector.broadcast %413 : vector<1x120xf32> to vector<15x120xf32>
    %416 = arith.mulf %414, %415 : vector<15x120xf32>
    %417 = arith.addf %410, %416 : vector<15x120xf32>
    %c0_334 = arith.constant 0 : index
    %c1_335 = arith.constant 1 : index
    %c3_336 = arith.constant 3 : index
    %c0_337 = arith.constant 0 : index
    %418 = vector.load %arg1[%c0_334, %c1_335, %c3_336, %c0_337] : memref<2x3x5x120xf32, #tpu.memory_space<vmem>>, vector<1x1x1x120xf32>
    %419 = vector.shape_cast %418 : vector<1x1x1x120xf32> to vector<120xf32>
    %420 = vector.shape_cast %419 : vector<120xf32> to vector<1x120xf32>
    %421 = vector.extract_strided_slice %396 {offsets = [0, 3], sizes = [15, 120], strides = [1, 1]} : vector<15x128xf32> to vector<15x120xf32>
    %422 = vector.broadcast %420 : vector<1x120xf32> to vector<15x120xf32>
    %423 = arith.mulf %421, %422 : vector<15x120xf32>
    %424 = arith.addf %417, %423 : vector<15x120xf32>
    %c0_338 = arith.constant 0 : index
    %c1_339 = arith.constant 1 : index
    %c4_340 = arith.constant 4 : index
    %c0_341 = arith.constant 0 : index
    %425 = vector.load %arg1[%c0_338, %c1_339, %c4_340, %c0_341] : memref<2x3x5x120xf32, #tpu.memory_space<vmem>>, vector<1x1x1x120xf32>
    %426 = vector.shape_cast %425 : vector<1x1x1x120xf32> to vector<120xf32>
    %427 = vector.shape_cast %426 : vector<120xf32> to vector<1x120xf32>
    %428 = vector.extract_strided_slice %396 {offsets = [0, 4], sizes = [15, 120], strides = [1, 1]} : vector<15x128xf32> to vector<15x120xf32>
    %429 = vector.broadcast %427 : vector<1x120xf32> to vector<15x120xf32>
    %430 = arith.mulf %428, %429 : vector<15x120xf32>
    %431 = arith.addf %424, %430 : vector<15x120xf32>
    %432 = vector.extract_strided_slice %359 {offsets = [3, 0], sizes = [15, 128], strides = [1, 1]} : vector<18x128xf32> to vector<15x128xf32>
    %c0_342 = arith.constant 0 : index
    %c2_343 = arith.constant 2 : index
    %c0_344 = arith.constant 0 : index
    %c0_345 = arith.constant 0 : index
    %433 = vector.load %arg1[%c0_342, %c2_343, %c0_344, %c0_345] : memref<2x3x5x120xf32, #tpu.memory_space<vmem>>, vector<1x1x1x120xf32>
    %434 = vector.shape_cast %433 : vector<1x1x1x120xf32> to vector<120xf32>
    %435 = vector.shape_cast %434 : vector<120xf32> to vector<1x120xf32>
    %436 = vector.extract_strided_slice %432 {offsets = [0, 0], sizes = [15, 120], strides = [1, 1]} : vector<15x128xf32> to vector<15x120xf32>
    %437 = vector.broadcast %435 : vector<1x120xf32> to vector<15x120xf32>
    %438 = arith.mulf %436, %437 : vector<15x120xf32>
    %439 = arith.addf %395, %438 : vector<15x120xf32>
    %c0_346 = arith.constant 0 : index
    %c2_347 = arith.constant 2 : index
    %c1_348 = arith.constant 1 : index
    %c0_349 = arith.constant 0 : index
    %440 = vector.load %arg1[%c0_346, %c2_347, %c1_348, %c0_349] : memref<2x3x5x120xf32, #tpu.memory_space<vmem>>, vector<1x1x1x120xf32>
    %441 = vector.shape_cast %440 : vector<1x1x1x120xf32> to vector<120xf32>
    %442 = vector.shape_cast %441 : vector<120xf32> to vector<1x120xf32>
    %443 = vector.extract_strided_slice %432 {offsets = [0, 1], sizes = [15, 120], strides = [1, 1]} : vector<15x128xf32> to vector<15x120xf32>
    %444 = vector.broadcast %442 : vector<1x120xf32> to vector<15x120xf32>
    %445 = arith.mulf %443, %444 : vector<15x120xf32>
    %446 = arith.addf %439, %445 : vector<15x120xf32>
    %c0_350 = arith.constant 0 : index
    %c2_351 = arith.constant 2 : index
    %c2_352 = arith.constant 2 : index
    %c0_353 = arith.constant 0 : index
    %447 = vector.load %arg1[%c0_350, %c2_351, %c2_352, %c0_353] : memref<2x3x5x120xf32, #tpu.memory_space<vmem>>, vector<1x1x1x120xf32>
    %448 = vector.shape_cast %447 : vector<1x1x1x120xf32> to vector<120xf32>
    %449 = vector.shape_cast %448 : vector<120xf32> to vector<1x120xf32>
    %450 = vector.extract_strided_slice %432 {offsets = [0, 2], sizes = [15, 120], strides = [1, 1]} : vector<15x128xf32> to vector<15x120xf32>
    %451 = vector.broadcast %449 : vector<1x120xf32> to vector<15x120xf32>
    %452 = arith.mulf %450, %451 : vector<15x120xf32>
    %453 = arith.addf %446, %452 : vector<15x120xf32>
    %c0_354 = arith.constant 0 : index
    %c2_355 = arith.constant 2 : index
    %c3_356 = arith.constant 3 : index
    %c0_357 = arith.constant 0 : index
    %454 = vector.load %arg1[%c0_354, %c2_355, %c3_356, %c0_357] : memref<2x3x5x120xf32, #tpu.memory_space<vmem>>, vector<1x1x1x120xf32>
    %455 = vector.shape_cast %454 : vector<1x1x1x120xf32> to vector<120xf32>
    %456 = vector.shape_cast %455 : vector<120xf32> to vector<1x120xf32>
    %457 = vector.extract_strided_slice %432 {offsets = [0, 3], sizes = [15, 120], strides = [1, 1]} : vector<15x128xf32> to vector<15x120xf32>
    %458 = vector.broadcast %456 : vector<1x120xf32> to vector<15x120xf32>
    %459 = arith.mulf %457, %458 : vector<15x120xf32>
    %460 = arith.addf %453, %459 : vector<15x120xf32>
    %c0_358 = arith.constant 0 : index
    %c2_359 = arith.constant 2 : index
    %c4_360 = arith.constant 4 : index
    %c0_361 = arith.constant 0 : index
    %461 = vector.load %arg1[%c0_358, %c2_359, %c4_360, %c0_361] : memref<2x3x5x120xf32, #tpu.memory_space<vmem>>, vector<1x1x1x120xf32>
    %462 = vector.shape_cast %461 : vector<1x1x1x120xf32> to vector<120xf32>
    %463 = vector.shape_cast %462 : vector<120xf32> to vector<1x120xf32>
    %464 = vector.extract_strided_slice %432 {offsets = [0, 4], sizes = [15, 120], strides = [1, 1]} : vector<15x128xf32> to vector<15x120xf32>
    %465 = vector.broadcast %463 : vector<1x120xf32> to vector<15x120xf32>
    %466 = arith.mulf %464, %465 : vector<15x120xf32>
    %467 = arith.addf %460, %466 : vector<15x120xf32>
    %c1_362 = arith.constant 1 : index
    %c0_363 = arith.constant 0 : index
    %c0_364 = arith.constant 0 : index
    %468 = vector.load %arg5[%c1_362, %c0_363, %c0_364] : memref<2x18x128xf32, #tpu.memory_space<vmem>>, vector<1x18x128xf32>
    %469 = vector.shape_cast %468 : vector<1x18x128xf32> to vector<18x128xf32>
    %470 = vector.extract_strided_slice %469 {offsets = [0, 0], sizes = [15, 128], strides = [1, 1]} : vector<18x128xf32> to vector<15x128xf32>
    %c1_365 = arith.constant 1 : index
    %c0_366 = arith.constant 0 : index
    %c0_367 = arith.constant 0 : index
    %c0_368 = arith.constant 0 : index
    %471 = vector.load %arg1[%c1_365, %c0_366, %c0_367, %c0_368] : memref<2x3x5x120xf32, #tpu.memory_space<vmem>>, vector<1x1x1x120xf32>
    %472 = vector.shape_cast %471 : vector<1x1x1x120xf32> to vector<120xf32>
    %473 = vector.shape_cast %472 : vector<120xf32> to vector<1x120xf32>
    %474 = vector.extract_strided_slice %470 {offsets = [0, 0], sizes = [15, 120], strides = [1, 1]} : vector<15x128xf32> to vector<15x120xf32>
    %475 = vector.broadcast %473 : vector<1x120xf32> to vector<15x120xf32>
    %476 = arith.mulf %474, %475 : vector<15x120xf32>
    %477 = arith.addf %467, %476 : vector<15x120xf32>
    %c1_369 = arith.constant 1 : index
    %c0_370 = arith.constant 0 : index
    %c1_371 = arith.constant 1 : index
    %c0_372 = arith.constant 0 : index
    %478 = vector.load %arg1[%c1_369, %c0_370, %c1_371, %c0_372] : memref<2x3x5x120xf32, #tpu.memory_space<vmem>>, vector<1x1x1x120xf32>
    %479 = vector.shape_cast %478 : vector<1x1x1x120xf32> to vector<120xf32>
    %480 = vector.shape_cast %479 : vector<120xf32> to vector<1x120xf32>
    %481 = vector.extract_strided_slice %470 {offsets = [0, 1], sizes = [15, 120], strides = [1, 1]} : vector<15x128xf32> to vector<15x120xf32>
    %482 = vector.broadcast %480 : vector<1x120xf32> to vector<15x120xf32>
    %483 = arith.mulf %481, %482 : vector<15x120xf32>
    %484 = arith.addf %477, %483 : vector<15x120xf32>
    %c1_373 = arith.constant 1 : index
    %c0_374 = arith.constant 0 : index
    %c2_375 = arith.constant 2 : index
    %c0_376 = arith.constant 0 : index
    %485 = vector.load %arg1[%c1_373, %c0_374, %c2_375, %c0_376] : memref<2x3x5x120xf32, #tpu.memory_space<vmem>>, vector<1x1x1x120xf32>
    %486 = vector.shape_cast %485 : vector<1x1x1x120xf32> to vector<120xf32>
    %487 = vector.shape_cast %486 : vector<120xf32> to vector<1x120xf32>
    %488 = vector.extract_strided_slice %470 {offsets = [0, 2], sizes = [15, 120], strides = [1, 1]} : vector<15x128xf32> to vector<15x120xf32>
    %489 = vector.broadcast %487 : vector<1x120xf32> to vector<15x120xf32>
    %490 = arith.mulf %488, %489 : vector<15x120xf32>
    %491 = arith.addf %484, %490 : vector<15x120xf32>
    %c1_377 = arith.constant 1 : index
    %c0_378 = arith.constant 0 : index
    %c3_379 = arith.constant 3 : index
    %c0_380 = arith.constant 0 : index
    %492 = vector.load %arg1[%c1_377, %c0_378, %c3_379, %c0_380] : memref<2x3x5x120xf32, #tpu.memory_space<vmem>>, vector<1x1x1x120xf32>
    %493 = vector.shape_cast %492 : vector<1x1x1x120xf32> to vector<120xf32>
    %494 = vector.shape_cast %493 : vector<120xf32> to vector<1x120xf32>
    %495 = vector.extract_strided_slice %470 {offsets = [0, 3], sizes = [15, 120], strides = [1, 1]} : vector<15x128xf32> to vector<15x120xf32>
    %496 = vector.broadcast %494 : vector<1x120xf32> to vector<15x120xf32>
    %497 = arith.mulf %495, %496 : vector<15x120xf32>
    %498 = arith.addf %491, %497 : vector<15x120xf32>
    %c1_381 = arith.constant 1 : index
    %c0_382 = arith.constant 0 : index
    %c4_383 = arith.constant 4 : index
    %c0_384 = arith.constant 0 : index
    %499 = vector.load %arg1[%c1_381, %c0_382, %c4_383, %c0_384] : memref<2x3x5x120xf32, #tpu.memory_space<vmem>>, vector<1x1x1x120xf32>
    %500 = vector.shape_cast %499 : vector<1x1x1x120xf32> to vector<120xf32>
    %501 = vector.shape_cast %500 : vector<120xf32> to vector<1x120xf32>
    %502 = vector.extract_strided_slice %470 {offsets = [0, 4], sizes = [15, 120], strides = [1, 1]} : vector<15x128xf32> to vector<15x120xf32>
    %503 = vector.broadcast %501 : vector<1x120xf32> to vector<15x120xf32>
    %504 = arith.mulf %502, %503 : vector<15x120xf32>
    %505 = arith.addf %498, %504 : vector<15x120xf32>
    %506 = vector.extract_strided_slice %469 {offsets = [2, 0], sizes = [15, 128], strides = [1, 1]} : vector<18x128xf32> to vector<15x128xf32>
    %c1_385 = arith.constant 1 : index
    %c1_386 = arith.constant 1 : index
    %c0_387 = arith.constant 0 : index
    %c0_388 = arith.constant 0 : index
    %507 = vector.load %arg1[%c1_385, %c1_386, %c0_387, %c0_388] : memref<2x3x5x120xf32, #tpu.memory_space<vmem>>, vector<1x1x1x120xf32>
    %508 = vector.shape_cast %507 : vector<1x1x1x120xf32> to vector<120xf32>
    %509 = vector.shape_cast %508 : vector<120xf32> to vector<1x120xf32>
    %510 = vector.extract_strided_slice %506 {offsets = [0, 0], sizes = [15, 120], strides = [1, 1]} : vector<15x128xf32> to vector<15x120xf32>
    %511 = vector.broadcast %509 : vector<1x120xf32> to vector<15x120xf32>
    %512 = arith.mulf %510, %511 : vector<15x120xf32>
    %513 = arith.addf %431, %512 : vector<15x120xf32>
    %c1_389 = arith.constant 1 : index
    %c1_390 = arith.constant 1 : index
    %c1_391 = arith.constant 1 : index
    %c0_392 = arith.constant 0 : index
    %514 = vector.load %arg1[%c1_389, %c1_390, %c1_391, %c0_392] : memref<2x3x5x120xf32, #tpu.memory_space<vmem>>, vector<1x1x1x120xf32>
    %515 = vector.shape_cast %514 : vector<1x1x1x120xf32> to vector<120xf32>
    %516 = vector.shape_cast %515 : vector<120xf32> to vector<1x120xf32>
    %517 = vector.extract_strided_slice %506 {offsets = [0, 1], sizes = [15, 120], strides = [1, 1]} : vector<15x128xf32> to vector<15x120xf32>
    %518 = vector.broadcast %516 : vector<1x120xf32> to vector<15x120xf32>
    %519 = arith.mulf %517, %518 : vector<15x120xf32>
    %520 = arith.addf %513, %519 : vector<15x120xf32>
    %c1_393 = arith.constant 1 : index
    %c1_394 = arith.constant 1 : index
    %c2_395 = arith.constant 2 : index
    %c0_396 = arith.constant 0 : index
    %521 = vector.load %arg1[%c1_393, %c1_394, %c2_395, %c0_396] : memref<2x3x5x120xf32, #tpu.memory_space<vmem>>, vector<1x1x1x120xf32>
    %522 = vector.shape_cast %521 : vector<1x1x1x120xf32> to vector<120xf32>
    %523 = vector.shape_cast %522 : vector<120xf32> to vector<1x120xf32>
    %524 = vector.extract_strided_slice %506 {offsets = [0, 2], sizes = [15, 120], strides = [1, 1]} : vector<15x128xf32> to vector<15x120xf32>
    %525 = vector.broadcast %523 : vector<1x120xf32> to vector<15x120xf32>
    %526 = arith.mulf %524, %525 : vector<15x120xf32>
    %527 = arith.addf %520, %526 : vector<15x120xf32>
    %c1_397 = arith.constant 1 : index
    %c1_398 = arith.constant 1 : index
    %c3_399 = arith.constant 3 : index
    %c0_400 = arith.constant 0 : index
    %528 = vector.load %arg1[%c1_397, %c1_398, %c3_399, %c0_400] : memref<2x3x5x120xf32, #tpu.memory_space<vmem>>, vector<1x1x1x120xf32>
    %529 = vector.shape_cast %528 : vector<1x1x1x120xf32> to vector<120xf32>
    %530 = vector.shape_cast %529 : vector<120xf32> to vector<1x120xf32>
    %531 = vector.extract_strided_slice %506 {offsets = [0, 3], sizes = [15, 120], strides = [1, 1]} : vector<15x128xf32> to vector<15x120xf32>
    %532 = vector.broadcast %530 : vector<1x120xf32> to vector<15x120xf32>
    %533 = arith.mulf %531, %532 : vector<15x120xf32>
    %534 = arith.addf %527, %533 : vector<15x120xf32>
    %c1_401 = arith.constant 1 : index
    %c1_402 = arith.constant 1 : index
    %c4_403 = arith.constant 4 : index
    %c0_404 = arith.constant 0 : index
    %535 = vector.load %arg1[%c1_401, %c1_402, %c4_403, %c0_404] : memref<2x3x5x120xf32, #tpu.memory_space<vmem>>, vector<1x1x1x120xf32>
    %536 = vector.shape_cast %535 : vector<1x1x1x120xf32> to vector<120xf32>
    %537 = vector.shape_cast %536 : vector<120xf32> to vector<1x120xf32>
    %538 = vector.extract_strided_slice %506 {offsets = [0, 4], sizes = [15, 120], strides = [1, 1]} : vector<15x128xf32> to vector<15x120xf32>
    %539 = vector.broadcast %537 : vector<1x120xf32> to vector<15x120xf32>
    %540 = arith.mulf %538, %539 : vector<15x120xf32>
    %541 = arith.addf %534, %540 : vector<15x120xf32>
    %542 = vector.extract_strided_slice %469 {offsets = [3, 0], sizes = [15, 128], strides = [1, 1]} : vector<18x128xf32> to vector<15x128xf32>
    %c1_405 = arith.constant 1 : index
    %c2_406 = arith.constant 2 : index
    %c0_407 = arith.constant 0 : index
    %c0_408 = arith.constant 0 : index
    %543 = vector.load %arg1[%c1_405, %c2_406, %c0_407, %c0_408] : memref<2x3x5x120xf32, #tpu.memory_space<vmem>>, vector<1x1x1x120xf32>
    %544 = vector.shape_cast %543 : vector<1x1x1x120xf32> to vector<120xf32>
    %545 = vector.shape_cast %544 : vector<120xf32> to vector<1x120xf32>
    %546 = vector.extract_strided_slice %542 {offsets = [0, 0], sizes = [15, 120], strides = [1, 1]} : vector<15x128xf32> to vector<15x120xf32>
    %547 = vector.broadcast %545 : vector<1x120xf32> to vector<15x120xf32>
    %548 = arith.mulf %546, %547 : vector<15x120xf32>
    %549 = arith.addf %505, %548 : vector<15x120xf32>
    %c1_409 = arith.constant 1 : index
    %c2_410 = arith.constant 2 : index
    %c1_411 = arith.constant 1 : index
    %c0_412 = arith.constant 0 : index
    %550 = vector.load %arg1[%c1_409, %c2_410, %c1_411, %c0_412] : memref<2x3x5x120xf32, #tpu.memory_space<vmem>>, vector<1x1x1x120xf32>
    %551 = vector.shape_cast %550 : vector<1x1x1x120xf32> to vector<120xf32>
    %552 = vector.shape_cast %551 : vector<120xf32> to vector<1x120xf32>
    %553 = vector.extract_strided_slice %542 {offsets = [0, 1], sizes = [15, 120], strides = [1, 1]} : vector<15x128xf32> to vector<15x120xf32>
    %554 = vector.broadcast %552 : vector<1x120xf32> to vector<15x120xf32>
    %555 = arith.mulf %553, %554 : vector<15x120xf32>
    %556 = arith.addf %549, %555 : vector<15x120xf32>
    %c1_413 = arith.constant 1 : index
    %c2_414 = arith.constant 2 : index
    %c2_415 = arith.constant 2 : index
    %c0_416 = arith.constant 0 : index
    %557 = vector.load %arg1[%c1_413, %c2_414, %c2_415, %c0_416] : memref<2x3x5x120xf32, #tpu.memory_space<vmem>>, vector<1x1x1x120xf32>
    %558 = vector.shape_cast %557 : vector<1x1x1x120xf32> to vector<120xf32>
    %559 = vector.shape_cast %558 : vector<120xf32> to vector<1x120xf32>
    %560 = vector.extract_strided_slice %542 {offsets = [0, 2], sizes = [15, 120], strides = [1, 1]} : vector<15x128xf32> to vector<15x120xf32>
    %561 = vector.broadcast %559 : vector<1x120xf32> to vector<15x120xf32>
    %562 = arith.mulf %560, %561 : vector<15x120xf32>
    %563 = arith.addf %556, %562 : vector<15x120xf32>
    %c1_417 = arith.constant 1 : index
    %c2_418 = arith.constant 2 : index
    %c3_419 = arith.constant 3 : index
    %c0_420 = arith.constant 0 : index
    %564 = vector.load %arg1[%c1_417, %c2_418, %c3_419, %c0_420] : memref<2x3x5x120xf32, #tpu.memory_space<vmem>>, vector<1x1x1x120xf32>
    %565 = vector.shape_cast %564 : vector<1x1x1x120xf32> to vector<120xf32>
    %566 = vector.shape_cast %565 : vector<120xf32> to vector<1x120xf32>
    %567 = vector.extract_strided_slice %542 {offsets = [0, 3], sizes = [15, 120], strides = [1, 1]} : vector<15x128xf32> to vector<15x120xf32>
    %568 = vector.broadcast %566 : vector<1x120xf32> to vector<15x120xf32>
    %569 = arith.mulf %567, %568 : vector<15x120xf32>
    %570 = arith.addf %563, %569 : vector<15x120xf32>
    %c1_421 = arith.constant 1 : index
    %c2_422 = arith.constant 2 : index
    %c4_423 = arith.constant 4 : index
    %c0_424 = arith.constant 0 : index
    %571 = vector.load %arg1[%c1_421, %c2_422, %c4_423, %c0_424] : memref<2x3x5x120xf32, #tpu.memory_space<vmem>>, vector<1x1x1x120xf32>
    %572 = vector.shape_cast %571 : vector<1x1x1x120xf32> to vector<120xf32>
    %573 = vector.shape_cast %572 : vector<120xf32> to vector<1x120xf32>
    %574 = vector.extract_strided_slice %542 {offsets = [0, 4], sizes = [15, 120], strides = [1, 1]} : vector<15x128xf32> to vector<15x120xf32>
    %575 = vector.broadcast %573 : vector<1x120xf32> to vector<15x120xf32>
    %576 = arith.mulf %574, %575 : vector<15x120xf32>
    %577 = arith.addf %570, %576 : vector<15x120xf32>
    %c1_425 = arith.constant 1 : index
    %c0_426 = arith.constant 0 : index
    %c0_427 = arith.constant 0 : index
    %c0_428 = arith.constant 0 : index
    %578 = vector.load %arg4[%c1_425, %c0_426, %c0_427, %c0_428] : memref<2x2x15x120xf32, #tpu.memory_space<vmem>>, vector<1x1x15x120xf32>
    %579 = vector.shape_cast %578 : vector<1x1x15x120xf32> to vector<15x120xf32>
    %580 = vector.shape_cast %577 : vector<15x120xf32> to vector<1x1x15x120xf32>
    tpu.vector_store %arg4[%c1_425, %c0_426, %c0_427, %c0_428], %580 {strides = array<i32>} : memref<2x2x15x120xf32, #tpu.memory_space<vmem>>, vector<1x1x15x120xf32>,
    %c1_429 = arith.constant 1 : index
    %c1_430 = arith.constant 1 : index
    %c0_431 = arith.constant 0 : index
    %c0_432 = arith.constant 0 : index
    %581 = vector.load %arg4[%c1_429, %c1_430, %c0_431, %c0_432] : memref<2x2x15x120xf32, #tpu.memory_space<vmem>>, vector<1x1x15x120xf32>
    %582 = vector.shape_cast %581 : vector<1x1x15x120xf32> to vector<15x120xf32>
    %583 = vector.shape_cast %541 : vector<15x120xf32> to vector<1x1x15x120xf32>
    tpu.vector_store %arg4[%c1_429, %c1_430, %c0_431, %c0_432], %583 {strides = array<i32>} : memref<2x2x15x120xf32, #tpu.memory_space<vmem>>, vector<1x1x15x120xf32>,
    return
  }
  func.func @transform_0(%arg0: i32) -> (i32, i32, i32, i32) {
    %c0_i32 = arith.constant 0 : i32
    %c0_i32_0 = arith.constant 0 : i32
    %c0_i32_1 = arith.constant 0 : i32
    %c0_i32_2 = arith.constant 0 : i32
    %c0_i32_3 = arith.constant 0 : i32
    return %c0_i32, %c0_i32_0, %c0_i32_1, %c0_i32_2 : i32, i32, i32, i32
  }
  func.func @transform_1(%arg0: i32) -> (i32, i32) {
    %c0_i32 = arith.constant 0 : i32
    %c0_i32_0 = arith.constant 0 : i32
    %c0_i32_1 = arith.constant 0 : i32
    return %c0_i32, %c0_i32_0 : i32, i32
  }
  func.func @transform_2(%arg0: i32) -> (i32, i32, i32, i32) {
    %c0_i32 = arith.constant 0 : i32
    %c0_i32_0 = arith.constant 0 : i32
    %c0_i32_1 = arith.constant 0 : i32
    %c0_i32_2 = arith.constant 0 : i32
    return %arg0, %c0_i32, %c0_i32_0, %c0_i32_1 : i32, i32, i32, i32
  }
  func.func @transform_3(%arg0: i32) -> (i32, i32, i32, i32) {
    %c0_i32 = arith.constant 0 : i32
    %c0_i32_0 = arith.constant 0 : i32
    %c0_i32_1 = arith.constant 0 : i32
    %c0_i32_2 = arith.constant 0 : i32
    return %arg0, %c0_i32, %c0_i32_0, %c0_i32_1 : i32, i32, i32, i32
  }
}

</mosaic_0001>

<bundles_post_ra>
// kernel: conv_transpose2d.1
= control target key start
LH: loop header
LB: loop body
LE: loop exit
PB: predicated region body
PF: predicated region fallthrough
CT: control target
= control target key end

     0   :  { %v1928_v1 = vmov 0.0   ;;  %s1929_s14 = smov 22   ;;  %s1930_s15 = smov 2   ;;  %vm30_vm0 = vcmask 146448   ;;  %vm43_vm1 = vcmask 310448   ;;  %vm56_vm2 = vcmask 474448   ;;  %s2972_s2 = inlined_call_operand.vmem [shape: f32[2,4,16,16], index: 2, kind: input, shape index: {}]   ;;  %s2973_s0 = inlined_call_operand.vmem [shape: f32[2,3,5,120], index: 0, kind: input, shape index: {}]   ;;  %s2974_s1 = inlined_call_operand.vmem [shape: f32[1,120], index: 1, kind: input, shape index: {}]   ;;  %s2975_s3 = inlined_call_operand.vmem [shape: f32[2,2,15,120], index: 3, kind: output, shape index: {}]  }
   0x1   :  { %v33_v0 = vld [vmem:[%s2972_s2] sm:$0xff]  ;;  %14 = vst [vmem:[#allocation2] sm:$0xff] %v1928_v1  ;;  %15 = vst [vmem:[#allocation2 + $0x8] sm:$0xff] %v1928_v1  ;;  %v34_v2 = vld [vmem:[%s2972_s2 + $0x8] sm:$0xff]  ;;  %s1931_s18 = smov 42   ;;  %s1932_s23 = smov 62  }
   0x2   :  { %16 = vst [vmem:[#allocation2 + $0x10] sm:$0x3] %v1928_v1  ;;  %17 = vst [vmem:[#allocation2 + $0x18] sm:$0xff] %v1928_v1  ;;  %37 = vrot.lane.b32.xlu1 %v33_v0, %s1929_s14  ;;  %24 = vrot.lane.b32.xlu0 %v33_v0, %s1930_s15  ;;  %v1752_v3 = vld [vmem:[%s2972_s2 + $0x28] sm:$0xff]  ;;  %v1751_v4 = vld [vmem:[%s2972_s2 + $0x20] sm:$0xff]  ;;  %s1933_s24 = smov 82  }
   0x3   :  { %18 = vst [vmem:[#allocation2 + $0x20] sm:$0xff] %v1928_v1  ;;  %19 = vst [vmem:[#allocation2 + $0x28] sm:$0x3] %v1928_v1  ;;  %s1934_s25 = smov 102   ;;  %v1758_v5 = vld [vmem:[%s2972_s2 + $0x18] sm:$0xff]  ;;  %v1757_v6 = vld [vmem:[%s2972_s2 + $0x10] sm:$0xff] }
   0x4   :  { %v1764_v7 = vld [vmem:[%s2972_s2 + $0x38] sm:$0xff]  ;;  %v1763_v8 = vld [vmem:[%s2972_s2 + $0x30] sm:$0xff]  ;;  %v1772_v9 = vld [vmem:[%s2973_s0 + $0x2] ss:$0 sm:$0xff]  ;;  %s1935_s11 = smov 1   ;;  %s1936_s19 = smov 4  }
   0x5   :  { %v1771_v10 = vld [vmem:[%s2973_s0 + $0x1] ss:$0 sm:$0xff]  ;;  %v1774_v11 = vld [vmem:[%s2973_s0 + $0x4] ss:$0 sm:$0xff]  ;;  %v1773_v12 = vld [vmem:[%s2973_s0 + $0x3] ss:$0 sm:$0xff] }
   0x6   :  { %39 = vrot.lane.b32.xlu1 %v34_v2, %s1929_s14  ;;  %26 = vrot.lane.b32.xlu0 %v34_v2, %s1930_s15  ;;  %s1937_s20 = smov 3   ;;  %v1790_v13 = vld [vmem:[%s2973_s0 + $0x12] ss:$0 sm:$0xff]  ;;  %v1778_v14 = vld [vmem:[%s2973_s0 + $0x9] ss:$0 sm:$0xff]  ;;  %vm70_vm3 = vcmask 638448  }
   0x7   :  { %v1794_v15 = vld [vmem:[%s2973_s0 + $0x14] ss:$0 sm:$0xff]  ;;  %v1780_v16 = vld [vmem:[%s2973_s0 + $0xa] ss:$0 sm:$0xff]  ;;  %v1800_v17 = vld [vmem:[%s2973_s0 + $0x1a] ss:$0 sm:$0xff] }
   0x8   :  { %v1782_v18 = vld [vmem:[%s2973_s0 + $0xb] ss:$0 sm:$0xff]  ;;  %v1784_v19 = vld [vmem:[%s2973_s0 + $0xc] ss:$0 sm:$0xff]  ;;  %v1788_v20 = vld [vmem:[%s2973_s0 + $0x11] ss:$0 sm:$0xff] }
   0x9   :  { %v1792_v21 = vld [vmem:[%s2973_s0 + $0x13] ss:$0 sm:$0xff]  ;;  %v1798_v22 = vld [vmem:[%s2973_s0 + $0x19] ss:$0 sm:$0xff]  ;;  %vm83_vm4 = vcmask 802448   ;;  %vm96_vm5 = vcmask 966448  }
   0xa   :  { %52 = vrot.lane.b32.xlu1 %v34_v2, %s1931_s18  ;;  %50 = vrot.lane.b32.xlu0 %v33_v0, %s1931_s18  ;;  %s1938_s26 = smov 127   ;;  %s1939_s27 = smov 126   ;;  %vm409_vm6 = vcmask 1044480   ;;  %vm881_vm7 = vcmask 982016   ;;  %vm886_vm8 = vcmask 982018   ;;  %vm889_vm9 = vcmask 974848  }
   0xb   :  { %s1940_s28 = smov 125   ;;  %s1941_s29 = smov 124   ;;  %vm883_vm10 = vcmask 980992  }
   0xe   :  { %66 = vrot.lane.b32.xlu1 %v1752_v3, %s1932_s23  ;;  %64 = vrot.lane.b32.xlu0 %v1751_v4, %s1932_s23 }
  0x12   :  { %79 = vrot.lane.b32.xlu1 %v1752_v3, %s1933_s24  ;;  %77 = vrot.lane.b32.xlu0 %v1751_v4, %s1933_s24 }
  0x16   :  { %92 = vrot.lane.b32.xlu1 %v1752_v3, %s1934_s25  ;;  %90 = vrot.lane.b32.xlu0 %v1751_v4, %s1934_s25 }
  0x1a   :  { %106 = vrot.lane.b32.xlu1 %v1758_v5, %s1930_s15  ;;  %104 = vrot.lane.b32.xlu0 %v1757_v6, %s1930_s15 }
  0x1e   :  { %119 = vrot.lane.b32.xlu1 %v1758_v5, %s1929_s14  ;;  %117 = vrot.lane.b32.xlu0 %v1757_v6, %s1929_s14 }
  0x22   :  { %131 = vrot.lane.b32.xlu1 %v1758_v5, %s1931_s18  ;;  %129 = vrot.lane.b32.xlu0 %v1757_v6, %s1931_s18 }
  0x26   :  { %144 = vrot.lane.b32.xlu1 %v1764_v7, %s1932_s23  ;;  %142 = vrot.lane.b32.xlu0 %v1763_v8, %s1932_s23 }
  0x2a   :  { %156 = vrot.lane.b32.xlu1 %v1764_v7, %s1933_s24  ;;  %154 = vrot.lane.b32.xlu0 %v1763_v8, %s1933_s24 }
  0x2e   :  { %168 = vrot.lane.b32.xlu1 %v1764_v7, %s1934_s25  ;;  %166 = vrot.lane.b32.xlu0 %v1763_v8, %s1934_s25 }
  0x32   :  { %220 = vrot.lane.b32.xlu1 %v1772_v9, %s1930_s15  ;;  %199 = vrot.lane.b32.xlu0 %v1771_v10, %s1935_s11 }
  0x36   :  { %262 = vrot.lane.b32.xlu1 %v1774_v11, %s1936_s19  ;;  %241 = vrot.lane.b32.xlu0 %v1773_v12, %s1937_s20 }
  0x3a   :  { %453 = vrot.lane.b32.xlu1 %v1790_v13, %s1930_s15  ;;  %295 = vrot.lane.b32.xlu0 %v1778_v14, %s1935_s11 }
  0x3e   :  { %509 = vrot.lane.b32.xlu1 %v1794_v15, %s1936_s19  ;;  %322 = vrot.lane.b32.xlu0 %v1780_v16, %s1930_s15 }
  0x42   :  { %571 = vrot.lane.b32.xlu1 %v1800_v17, %s1930_s15  ;;  %349 = vrot.lane.b32.xlu0 %v1782_v18, %s1937_s20 }
  0x46   :  { %376 = vrot.lane.b32.xlu0 %v1784_v19, %s1936_s19 }
  0x4a   :  { %425 = vrot.lane.b32.xlu0 %v1788_v20, %s1935_s11 }
  0x4e   :  { %481 = vrot.lane.b32.xlu0 %v1792_v21, %s1937_s20 }
  0x52   :  { %550 = vrot.lane.b32.xlu0 %v1798_v22, %s1935_s11 }
  0x74   :  { %v38_v23 = vpop.permute.xlu1 %37  ;;  %v25_v24 = vpop.permute.xlu0 %24 }
  0x75   :  { %31 = vst.msk [vmem:[#allocation2 + $0x1] sm:$0xff] %vm30_vm0, %v25_v24 }
  0x76   :  { %44 = vst.msk [vmem:[#allocation2 + $0x1] sm:$0xff] %vm43_vm1, %v38_v23 }
  0x78   :  { %v40_v25 = vpop.permute.xlu1 %39  ;;  %v27_v26 = vpop.permute.xlu0 %26 }
  0x79   :  { %32 = vst.msk [vmem:[#allocation2 + $0x9] sm:$0xff] %vm30_vm0, %v27_v26 }
  0x7a   :  { %45 = vst.msk [vmem:[#allocation2 + $0x9] sm:$0xff] %vm43_vm1, %v40_v25 }
  0x7c   :  { %v53_v27 = vpop.permute.xlu1 %52  ;;  %v51_v28 = vpop.permute.xlu0 %50 }
  0x7d   :  { %58 = vst.msk [vmem:[#allocation2 + $0x9] sm:$0xff] %vm56_vm2, %v53_v27  ;;  %57 = vst.msk [vmem:[#allocation2 + $0x1] sm:$0xff] %vm56_vm2, %v51_v28 }
  0x80   :  { %v67_v29 = vpop.permute.xlu1 %66  ;;  %v65_v30 = vpop.permute.xlu0 %64 }
  0x81   :  { %72 = vst.msk [vmem:[#allocation2 + $0x9] sm:$0xff] %vm70_vm3, %v67_v29  ;;  %71 = vst.msk [vmem:[#allocation2 + $0x1] sm:$0xff] %vm70_vm3, %v65_v30 }
  0x84   :  { %v80_v31 = vpop.permute.xlu1 %79  ;;  %v78_v32 = vpop.permute.xlu0 %77 }
  0x85   :  { %85 = vst.msk [vmem:[#allocation2 + $0x9] sm:$0xff] %vm83_vm4, %v80_v31  ;;  %84 = vst.msk [vmem:[#allocation2 + $0x1] sm:$0xff] %vm83_vm4, %v78_v32 }
  0x88   :  { %v93_v33 = vpop.permute.xlu1 %92  ;;  %v91_v34 = vpop.permute.xlu0 %90 }
  0x89   :  { %98 = vst.msk [vmem:[#allocation2 + $0x9] sm:$0xff] %vm96_vm5, %v93_v33  ;;  %97 = vst.msk [vmem:[#allocation2 + $0x1] sm:$0xff] %vm96_vm5, %v91_v34 }
  0x8c   :  { %v107_v35 = vpop.permute.xlu1 %106  ;;  %v105_v36 = vpop.permute.xlu0 %104 }
  0x8d   :  { %112 = vst.msk [vmem:[#allocation2 + $0x21] sm:$0xff] %vm30_vm0, %v107_v35  ;;  %111 = vst.msk [vmem:[#allocation2 + $0x19] sm:$0xff] %vm30_vm0, %v105_v36 }
  0x90   :  { %v120_v37 = vpop.permute.xlu1 %119  ;;  %v118_v38 = vpop.permute.xlu0 %117  ;;  %v2090_v47 = vld [vmem:[#allocation2] sm:$0xff]  ;;  %v2092_v48 = vld [vmem:[#allocation2 + $0x8] sm:$0xff]  ;;  %v2114_v2 = vld [vmem:[#allocation2 + $0x10] sm:$0x3] }
  0x91   :  { %124 = vst.msk [vmem:[#allocation2 + $0x21] sm:$0xff] %vm43_vm1, %v120_v37  ;;  %123 = vst.msk [vmem:[#allocation2 + $0x19] sm:$0xff] %vm43_vm1, %v118_v38 }
  0x94   :  { %v132_v39 = vpop.permute.xlu1 %131  ;;  %v130_v40 = vpop.permute.xlu0 %129 }
  0x95   :  { %136 = vst.msk [vmem:[#allocation2 + $0x21] sm:$0xff] %vm56_vm2, %v132_v39  ;;  %135 = vst.msk [vmem:[#allocation2 + $0x19] sm:$0xff] %vm56_vm2, %v130_v40 }
  0x98   :  { %v145_v41 = vpop.permute.xlu1 %144  ;;  %v143_v42 = vpop.permute.xlu0 %142 }
  0x99   :  { %149 = vst.msk [vmem:[#allocation2 + $0x21] sm:$0xff] %vm70_vm3, %v145_v41  ;;  %148 = vst.msk [vmem:[#allocation2 + $0x19] sm:$0xff] %vm70_vm3, %v143_v42 }
  0x9c   :  { %v157_v43 = vpop.permute.xlu1 %156  ;;  %v155_v44 = vpop.permute.xlu0 %154 }
  0x9d   :  { %161 = vst.msk [vmem:[#allocation2 + $0x21] sm:$0xff] %vm83_vm4, %v157_v43  ;;  %160 = vst.msk [vmem:[#allocation2 + $0x19] sm:$0xff] %vm83_vm4, %v155_v44 }
  0xa0   :  { %v169_v45 = vpop.permute.xlu1 %168  ;;  %v167_v46 = vpop.permute.xlu0 %166 }
  0xa1   :  { %173 = vst.msk [vmem:[#allocation2 + $0x21] sm:$0xff] %vm96_vm5, %v169_v45  ;;  %172 = vst.msk [vmem:[#allocation2 + $0x19] sm:$0xff] %vm96_vm5, %v167_v46 }
  0xa4   :  { %v200_v49 = vpop.permute.xlu0 %199  ;;  %v221_v52 = vpop.permute.xlu1 %220 }
  0xa5   :  { %v202_v50 = vmul.f32 %v200_v49, %v2090_v47  ;;  %v203_v51 = vmul.f32 %v200_v49, %v2092_v48  ;;  %v223_v54 = vmul.f32 %v221_v52, %v2090_v47  ;;  %v224_v55 = vmul.f32 %v221_v52, %v2092_v48 }
  0xa7   :  { %208 = vrot.lane.b32.xlu0 %v203_v51, %s1938_s26  ;;  %206 = vrot.lane.b32.xlu1 %v202_v50, %s1938_s26 }
  0xa8   :  { %v242_v53 = vpop.permute.xlu0 %241  ;;  %v263_v59 = vpop.permute.xlu1 %262  ;;  %v2130_v15 = vld [vmem:[#allocation2 + $0x20] sm:$0xff]  ;;  %v2155_v41 = vld [vmem:[#allocation2 + $0x18] sm:$0xff] }
  0xa9   :  { %v244_v57 = vmul.f32 %v242_v53, %v2090_v47  ;;  %v245_v58 = vmul.f32 %v242_v53, %v2092_v48  ;;  %v265_v61 = vmul.f32 %v263_v59, %v2090_v47  ;;  %v266_v62 = vmul.f32 %v263_v59, %v2092_v48  ;;  %v2170_v53 = vld [vmem:[%s2973_s0 + $0x1b] ss:$0 sm:$0xff] }
  0xab   :  { %227 = vrot.lane.b32.xlu0 %v223_v54, %s1939_s27  ;;  %229 = vrot.lane.b32.xlu1 %v224_v55, %s1939_s27 }
  0xac   :  { %v296_v56 = vpop.permute.xlu0 %295  ;;  %v454_v12 = vpop.permute.xlu1 %453 }
  0xad   :  { %v299_v0 = vmul.f32 %v296_v56, %v2092_v48  ;;  %v298_v1 = vmul.f32 %v296_v56, %v2090_v47  ;;  %v300_v4 = vmul.f32 %v296_v56, %v2114_v2  ;;  %v456_v17 = vmul.f32 %v454_v12, %v2090_v47 }
  0xae   :  { %v457_v20 = vmul.f32 %v454_v12, %v2092_v48  ;;  %v458_v43 = vmul.f32 %v454_v12, %v2114_v2 }
  0xaf   :  { %250 = vrot.lane.b32.xlu0 %v245_v58, %s1940_s28  ;;  %248 = vrot.lane.b32.xlu1 %v244_v57, %s1940_s28  ;;  %v462_v24 = vrot.slane %v456_v17, 3 }
  0xb0   :  { %v323_v60 = vpop.permute.xlu0 %322  ;;  %v510_v25 = vpop.permute.xlu1 %509  ;;  %v463_v29 = vrot.slane %v457_v20, 3  ;;  %v465_v52 = vrot.slane %v458_v43, 3 }
  0xb1   :  { %v326_v5 = vmul.f32 %v323_v60, %v2092_v48  ;;  %v325_v7 = vmul.f32 %v323_v60, %v2090_v47  ;;  %v327_v10 = vmul.f32 %v323_v60, %v2114_v2  ;;  %v512_v30 = vmul.f32 %v510_v25, %v2090_v47 }
  0xb2   :  { %v513_v32 = vmul.f32 %v510_v25, %v2092_v48  ;;  %v464_v33 = vsel %vm409_vm6, %v462_v24, %v463_v29  ;;  %v514_v54 = vmul.f32 %v510_v25, %v2114_v2  ;;  %v466_v55 = vsel %vm409_vm6, %v463_v29, %v465_v52 }
  0xb3   :  { %269 = vrot.lane.b32.xlu0 %v265_v61, %s1941_s29  ;;  %271 = vrot.lane.b32.xlu1 %v266_v62, %s1941_s29  ;;  %v518_v39 = vrot.slane %v512_v30, 3 }
  0xb4   :  { %v350_v63 = vpop.permute.xlu0 %349  ;;  %v519_v40 = vrot.slane %v513_v32, 3  ;;  %v572_v44 = vpop.permute.xlu1 %571  ;;  %v521_v58 = vrot.slane %v514_v54, 3 }
  0xb5   :  { %v353_v8 = vmul.f32 %v350_v63, %v2092_v48  ;;  %v352_v19 = vmul.f32 %v350_v63, %v2090_v47  ;;  %v354_v23 = vmul.f32 %v350_v63, %v2114_v2  ;;  %v574_v49 = vmul.f32 %v572_v44, %v2155_v41 }
  0xb6   :  { %v520_v45 = vsel %vm409_vm6, %v518_v39, %v519_v40  ;;  %v522_v59 = vsel %vm409_vm6, %v519_v40, %v521_v58  ;;  %v575_v60 = vmul.f32 %v572_v44, %v2130_v15  ;;  %v2267_v39 = vld [vmem:[%s2973_s0 + $0x21] ss:$0 sm:$0xff] }
  0xb7   :  { %306 = vrot.lane.b32.xlu0 %v299_v0, %s1938_s26  ;;  %304 = vrot.lane.b32.xlu1 %v298_v1, %s1938_s26  ;;  %2983 = vst [vmem:[#allocation4_spill] sm:$0xff] %v2267_v39 }
  0xb8   :  { %v377_v3 = vpop.permute.xlu0 %376 }
  0xb9   :  { %v380_v11 = vmul.f32 %v377_v3, %v2092_v48  ;;  %v379_v31 = vmul.f32 %v377_v3, %v2090_v47  ;;  %v381_v36 = vmul.f32 %v377_v3, %v2114_v2 }
  0xbb   :  { %308 = vrot.lane.b32.xlu1 %v300_v4, %s1938_s26  ;;  %333 = vrot.lane.b32.xlu0 %v326_v5, %s1939_s27 }
  0xbc   :  { %v426_v6 = vpop.permute.xlu0 %425 }
  0xbd   :  { %v429_v13 = vmul.f32 %v426_v6, %v2092_v48  ;;  %v430_v14 = vmul.f32 %v426_v6, %v2114_v2  ;;  %v428_v37 = vmul.f32 %v426_v6, %v2090_v47 }
  0xbf   :  { %331 = vrot.lane.b32.xlu1 %v325_v7, %s1939_s27  ;;  %360 = vrot.lane.b32.xlu0 %v353_v8, %s1940_s28  ;;  %v435_v21 = vrot.slane %v429_v13, 3  ;;  %v437_v22 = vrot.slane %v430_v14, 3  ;;  %v434_v46 = vrot.slane %v428_v37, 3 }
  0xc0   :  { %v482_v9 = vpop.permute.xlu0 %481 }
  0xc1   :  { %v485_v26 = vmul.f32 %v482_v9, %v2092_v48  ;;  %v486_v27 = vmul.f32 %v482_v9, %v2114_v2  ;;  %v438_v28 = vsel %vm409_vm6, %v435_v21, %v437_v22  ;;  %v484_v50 = vmul.f32 %v482_v9, %v2090_v47 }
  0xc2   :  { %v436_v51 = vsel %vm409_vm6, %v434_v46, %v435_v21  ;;  %v2279_v46 = vld [vmem:[#allocation2 + $0x28] sm:$0x3] }
  0xc3   :  { %335 = vrot.lane.b32.xlu1 %v327_v10, %s1939_s27  ;;  %387 = vrot.lane.b32.xlu0 %v380_v11, %s1941_s29  ;;  %v491_v34 = vrot.slane %v485_v26, 3  ;;  %v493_v35 = vrot.slane %v486_v27, 3  ;;  %v490_v56 = vrot.slane %v484_v50, 3 }
  0xc4   :  { %v551_v16 = vpop.permute.xlu0 %550 }
  0xc5   :  { %v554_v18 = vmul.f32 %v551_v16, %v2130_v15  ;;  %v494_v38 = vsel %vm409_vm6, %v491_v34, %v493_v35  ;;  %v553_v42 = vmul.f32 %v551_v16, %v2155_v41  ;;  %v492_v57 = vsel %vm409_vm6, %v490_v56, %v491_v34  ;;  %v2218_v16 = vld [vmem:[%s2973_s0 + $0x1c] ss:$0 sm:$0xff]  ;;  %v2297_v56 = vld [vmem:[%s2973_s0 + $0x23] ss:$0 sm:$0xff] }
  0xc6   :  { %2982 = vst [vmem:[#allocation3_spill] sm:$0xff] %v2218_v16  ;;  %2985 = vst [vmem:[#allocation6_spill] sm:$0xff] %v2297_v56 }
  0xc7   :  { %358 = vrot.lane.b32.xlu1 %v352_v19, %s1940_s28  ;;  %559 = vrot.lane.b32.xlu0 %v554_v18, %s1938_s26 }
  0xcb   :  { %362 = vrot.lane.b32.xlu1 %v354_v23, %s1940_s28  ;;  %441 = vrot.lane.b32.xlu0 %v438_v28, %s1938_s26 }
  0xcf   :  { %385 = vrot.lane.b32.xlu1 %v379_v31, %s1941_s29  ;;  %467 = vrot.lane.b32.xlu0 %v464_v33, %s1939_s27 }
  0xd3   :  { %389 = vrot.lane.b32.xlu1 %v381_v36, %s1941_s29  ;;  %497 = vrot.lane.b32.xlu0 %v494_v38, %s1940_s28 }
  0xd7   :  { %523 = vrot.lane.b32.xlu0 %v520_v45, %s1941_s29  ;;  %557 = vrot.lane.b32.xlu1 %v553_v42, %s1938_s26 }
  0xdb   :  { %578 = vrot.lane.b32.xlu0 %v574_v49, %s1939_s27  ;;  %439 = vrot.lane.b32.xlu1 %v436_v51, %s1938_s26  ;;  %v2284_v49 = vld [vmem:[%s2973_s0 + $0x22] ss:$0 sm:$0xff] }
  0xdc   :  { %2984 = vst [vmem:[#allocation5_spill] sm:$0xff] %v2284_v49 }
  0xdf   :  { %592 = vrot.lane.b32.xlu0 %v2170_v53, %s1937_s20  ;;  %469 = vrot.lane.b32.xlu1 %v466_v55, %s1939_s27 }
  0xe3   :  { %495 = vrot.lane.b32.xlu1 %v492_v57, %s1940_s28 }
  0xe7   :  { %525 = vrot.lane.b32.xlu1 %v522_v59, %s1941_s29 }
  0xeb   :  { %580 = vrot.lane.b32.xlu1 %v575_v60, %s1939_s27 }
 0x119   :  { %v2183_v61 = vpop.permute.xlu0 %208  ;;  %v2222_v17 = vpop.permute.xlu1 %206 }
 0x11d   :  { %v2185_v62 = vpop.permute.xlu0 %227  ;;  %v2224_v18 = vpop.permute.xlu1 %229 }
 0x121   :  { %v2187_v63 = vpop.permute.xlu0 %250  ;;  %v2226_v19 = vpop.permute.xlu1 %248 }
 0x125   :  { %v2189_v0 = vpop.permute.xlu0 %269  ;;  %v2228_v20 = vpop.permute.xlu1 %271 }
 0x129   :  { %v2191_v1 = vpop.permute.xlu0 %306  ;;  %v2230_v21 = vpop.permute.xlu1 %304 }
 0x12d   :  { %v2193_v3 = vpop.permute.xlu0 %333  ;;  %v2232_v22 = vpop.permute.xlu1 %308 }
 0x131   :  { %v2195_v4 = vpop.permute.xlu0 %360  ;;  %v2234_v23 = vpop.permute.xlu1 %331 }
 0x135   :  { %v2197_v5 = vpop.permute.xlu0 %387  ;;  %v2236_v24 = vpop.permute.xlu1 %335 }
 0x139   :  { %v2199_v6 = vpop.permute.xlu0 %559  ;;  %v2238_v25 = vpop.permute.xlu1 %358 }
 0x13d   :  { %v2201_v7 = vpop.permute.xlu0 %441  ;;  %v2240_v26 = vpop.permute.xlu1 %362 }
 0x141   :  { %v2203_v8 = vpop.permute.xlu0 %467  ;;  %v2242_v27 = vpop.permute.xlu1 %385 }
 0x145   :  { %v2205_v9 = vpop.permute.xlu0 %497  ;;  %v2244_v28 = vpop.permute.xlu1 %389 }
 0x149   :  { %v2207_v10 = vpop.permute.xlu0 %523  ;;  %v2246_v29 = vpop.permute.xlu1 %557 }
 0x14d   :  { %v2209_v11 = vpop.permute.xlu0 %578  ;;  %v2248_v30 = vpop.permute.xlu1 %439 }
 0x151   :  { %v593_v12 = vpop.permute.xlu0 %592  ;;  %v2250_v31 = vpop.permute.xlu1 %469 }
 0x152   :  { %v595_v13 = vmul.f32 %v593_v12, %v2155_v41  ;;  %v596_v14 = vmul.f32 %v593_v12, %v2130_v15 }
 0x154   :  { %601 = vrot.lane.b32.xlu0 %v596_v14, %s1940_s28  ;;  %599 = vrot.lane.b32.xlu1 %v595_v13, %s1940_s28  ;;  %v2310_v13 = vld [vmem:[%s2973_s0 + $0x24] ss:$0 sm:$0xff] }
 0x155   :  { %v2252_v32 = vpop.permute.xlu1 %495  ;;  %2986 = vst [vmem:[#allocation7_spill] sm:$0xff] %v2310_v13 }
 0x158   :  { %613 = vrot.lane.b32.xlu1 %v2218_v16, %s1936_s19 }
 0x159   :  { %v2254_v33 = vpop.permute.xlu1 %525 }
 0x15d   :  { %v2256_v34 = vpop.permute.xlu1 %580 }
 0x1c6   :  { %v2258_v35 = vpop.permute.xlu1 %599  ;;  %v2271_v40 = vpop.permute.xlu0 %601 }
 0x1ca   :  { %v614_v36 = vpop.permute.xlu1 %613 }
 0x1cb   :  { %v616_v37 = vmul.f32 %v614_v36, %v2155_v41  ;;  %v617_v38 = vmul.f32 %v614_v36, %v2130_v15 }
 0x1cd   :  { %622 = vrot.lane.b32.xlu1 %v617_v38, %s1941_s29  ;;  %620 = vrot.lane.b32.xlu0 %v616_v37, %s1941_s29 }
 0x1d1   :  { %646 = vrot.lane.b32.xlu0 %v2267_v39, %s1935_s11 }
 0x23f   :  { %v2273_v42 = vpop.permute.xlu0 %620 }
 0x243   :  { %v647_v43 = vpop.permute.xlu0 %646 }
 0x244   :  { %v650_v44 = vmul.f32 %v647_v43, %v2130_v15  ;;  %v649_v45 = vmul.f32 %v647_v43, %v2155_v41  ;;  %v651_v50 = vmul.f32 %v647_v43, %v2279_v46 }
 0x246   :  { %657 = vrot.lane.b32.xlu0 %v650_v44, %s1938_s26  ;;  %655 = vrot.lane.b32.xlu1 %v649_v45, %s1938_s26  ;;  %v2323_v44 = vld [vmem:[%s2973_s0 + $0x29] ss:$0 sm:$0xff] }
 0x247   :  { %2987 = vst [vmem:[#allocation8_spill] sm:$0xff] %v2323_v44 }
 0x24a   :  { %673 = vrot.lane.b32.xlu0 %v2284_v49, %s1930_s15  ;;  %659 = vrot.lane.b32.xlu1 %v651_v50, %s1938_s26  ;;  %v2329_v50 = vpop.permute.xlu1 %622 }
 0x2b8   :  { %v658_v51 = vpop.permute.xlu0 %657 }
 0x2bc   :  { %v674_v52 = vpop.permute.xlu0 %673 }
 0x2bd   :  { %v677_v54 = vmul.f32 %v674_v52, %v2130_v15  ;;  %v676_v55 = vmul.f32 %v674_v52, %v2155_v41  ;;  %v678_v57 = vmul.f32 %v674_v52, %v2279_v46  ;;  %v656_v52 = vpop.permute.xlu1 %655 }
 0x2bf   :  { %684 = vrot.lane.b32.xlu0 %v677_v54, %s1939_s27  ;;  %682 = vrot.lane.b32.xlu1 %v676_v55, %s1939_s27  ;;  %v1776_v54 = vld [vmem:[%s2973_s0 + $0x8] ss:$0 sm:$0xff] }
 0x2c1   :  { %v660_v55 = vpop.permute.xlu1 %659 }
 0x2c3   :  { %700 = vrot.lane.b32.xlu0 %v2297_v56, %s1937_s20  ;;  %686 = vrot.lane.b32.xlu1 %v678_v57, %s1939_s27  ;;  %v283_v57 = vmul.f32 %v1776_v54, %v2090_v47 }
 0x331   :  { %v685_v58 = vpop.permute.xlu0 %684 }
 0x335   :  { %v701_v59 = vpop.permute.xlu0 %700 }
 0x336   :  { %v704_v60 = vmul.f32 %v701_v59, %v2130_v15  ;;  %v703_v12 = vmul.f32 %v701_v59, %v2155_v41  ;;  %v705_v14 = vmul.f32 %v701_v59, %v2279_v46  ;;  %v284_v59 = vmul.f32 %v1776_v54, %v2092_v48 }
 0x338   :  { %711 = vrot.lane.b32.xlu0 %v704_v60, %s1940_s28  ;;  %709 = vrot.lane.b32.xlu1 %v703_v12, %s1940_s28  ;;  %v2339_v60 = vld [vmem:[%s2974_s1] ss:$0 sm:$0xff]  ;;  %v683_v12 = vpop.permute.xlu1 %682 }
 0x33c   :  { %727 = vrot.lane.b32.xlu0 %v2310_v13, %s1936_s19  ;;  %713 = vrot.lane.b32.xlu1 %v705_v14, %s1940_s28  ;;  %v286_v14 = vadd.f32 %v2339_v60, %v283_v57  ;;  %v687_v39 = vpop.permute.xlu1 %686 }
 0x3aa   :  { %v712_v36 = vpop.permute.xlu0 %711 }
 0x3ae   :  { %v728_v37 = vpop.permute.xlu0 %727 }
 0x3af   :  { %v731_v38 = vmul.f32 %v728_v37, %v2130_v15  ;;  %v730_v43 = vmul.f32 %v728_v37, %v2155_v41  ;;  %v732_v45 = vmul.f32 %v728_v37, %v2279_v46  ;;  %v287_v37 = vadd.f32 %v2339_v60, %v284_v59 }
 0x3b1   :  { %738 = vrot.lane.b32.xlu0 %v731_v38, %s1941_s29  ;;  %736 = vrot.lane.b32.xlu1 %v730_v43, %s1941_s29  ;;  %v285_v38 = vmul.f32 %v1776_v54, %v2114_v2  ;;  %v313_v43 = vadd.f32 %v2230_v21, %v286_v14  ;;  %v1806_v54 = vld [vmem:[%s2973_s0 + $0x20] ss:$0 sm:$0xff] }
 0x3b2   :  { %v635_v14 = vmul.f32 %v1806_v54, %v2130_v15 }
 0x3b3   :  { %v288_v56 = vadd.f32 %v2339_v60, %v285_v38  ;;  %v340_v49 = vadd.f32 %v2234_v23, %v313_v43 }
 0x3b5   :  { %775 = vrot.lane.b32.xlu0 %v2323_v44, %s1935_s11  ;;  %740 = vrot.lane.b32.xlu1 %v732_v45, %s1941_s29  ;;  %v314_v45 = vadd.f32 %v2191_v1, %v287_v37  ;;  %v315_v44 = vadd.f32 %v2232_v22, %v288_v56  ;;  %v367_v57 = vadd.f32 %v2238_v25, %v340_v49 }
 0x3b6   :  { %v634_v22 = vmul.f32 %v1806_v54, %v2155_v41  ;;  %v636_v37 = vmul.f32 %v1806_v54, %v2279_v46 }
 0x3b7   :  { %v341_v13 = vadd.f32 %v2193_v3, %v314_v45  ;;  %v342_v21 = vadd.f32 %v2236_v24, %v315_v44  ;;  %v394_v59 = vadd.f32 %v2242_v27, %v367_v57  ;;  %v710_v3 = vpop.permute.xlu1 %709 }
 0x3b9   :  { %v368_v16 = vadd.f32 %v2195_v4, %v341_v13  ;;  %v369_v23 = vadd.f32 %v2240_v26, %v342_v21  ;;  %v637_v49 = vadd.f32 %v634_v22, %v394_v59 }
 0x3bb   :  { %v395_v1 = vadd.f32 %v2197_v5, %v368_v16  ;;  %v396_v4 = vadd.f32 %v2244_v28, %v369_v23  ;;  %v664_v13 = vadd.f32 %v656_v52, %v637_v49  ;;  %v714_v24 = vpop.permute.xlu1 %713 }
 0x3bd   :  { %v638_v25 = vadd.f32 %v635_v14, %v395_v1  ;;  %v639_v44 = vadd.f32 %v636_v37, %v396_v4  ;;  %v691_v16 = vadd.f32 %v683_v12, %v664_v13  ;;  %v2385_v14 = vld [vmem:[%s2973_s0 + $0x2a] ss:$0 sm:$0xff] }
 0x3bf   :  { %v665_v56 = vadd.f32 %v658_v51, %v638_v25  ;;  %v666_v27 = vadd.f32 %v660_v55, %v639_v44  ;;  %v718_v43 = vadd.f32 %v710_v3, %v691_v16  ;;  %v2401_v16 = vld [vmem:[%s2973_s0 + $0x2b] ss:$0 sm:$0xff] }
 0x3c1   :  { %v692_v5 = vadd.f32 %v685_v58, %v665_v56  ;;  %v693_v57 = vadd.f32 %v687_v39, %v666_v27 }
 0x3c3   :  { %v719_v38 = vadd.f32 %v712_v36, %v692_v5  ;;  %v720_v1 = vadd.f32 %v714_v24, %v693_v57 }
 0x423   :  { %v739_v26 = vpop.permute.xlu0 %738  ;;  %v737_v45 = vpop.permute.xlu1 %736 }
 0x424   :  { %v746_v21 = vadd.f32 %v739_v26, %v719_v38  ;;  %v745_v28 = vadd.f32 %v737_v45, %v718_v43 }
 0x426   :  { %1826 = vst.msk [vmem:[%s2975_s3 + $0x16] sm:$0xff] %vm881_vm7, %v746_v21 }
 0x427   :  { %1825 = vst.msk [vmem:[%s2975_s3 + $0xe] sm:$0xfc] %vm886_vm8, %v745_v28  ;;  %v776_v51 = vpop.permute.xlu0 %775  ;;  %v741_v58 = vpop.permute.xlu1 %740 }
 0x428   :  { %v778_v36 = vmul.f32 %v776_v51, %v2155_v41  ;;  %v779_v39 = vmul.f32 %v776_v51, %v2130_v15  ;;  %v780_v52 = vmul.f32 %v776_v51, %v2279_v46  ;;  %v747_v55 = vadd.f32 %v741_v58, %v720_v1 }
 0x42a   :  { %1827 = vst.msk [vmem:[%s2975_s3 + $0x1e] sm:$0x1] %vm889_vm9, %v747_v55  ;;  %v785_v12 = vrot.slane %v779_v39, 3  ;;  %v787_v54 = vrot.slane %v780_v52, 3  ;;  %v784_v59 = vrot.slane %v778_v36, 3 }
 0x42b   :  { %v2419_v36 = vld [vmem:[%s2973_s0 + $0x2c] ss:$0 sm:$0xff] }
 0x42c   :  { %v788_v3 = vsel %vm409_vm6, %v785_v12, %v787_v54  ;;  %v786_v23 = vsel %vm409_vm6, %v784_v59, %v785_v12 }
 0x42d   :  { %791 = vrot.lane.b32.xlu0 %v788_v3, %s1938_s26  ;;  %789 = vrot.lane.b32.xlu1 %v786_v23, %s1938_s26 }
 0x431   :  { %803 = vrot.lane.b32.xlu1 %v2385_v14, %s1930_s15 }
 0x49f   :  { %v2389_v22 = vpop.permute.xlu1 %789  ;;  %v2405_v27 = vpop.permute.xlu0 %791 }
 0x4a3   :  { %v804_v4 = vpop.permute.xlu1 %803 }
 0x4a4   :  { %v806_v25 = vmul.f32 %v804_v4, %v2155_v41  ;;  %v807_v49 = vmul.f32 %v804_v4, %v2130_v15  ;;  %v808_v56 = vmul.f32 %v804_v4, %v2279_v46 }
 0x4a6   :  { %v813_v13 = vrot.slane %v807_v49, 3  ;;  %v815_v37 = vrot.slane %v808_v56, 3  ;;  %v812_v24 = vrot.slane %v806_v25, 3  ;;  %v1829_v56 = vld [vmem:[%s2972_s2 + $0x48] sm:$0xff] }
 0x4a8   :  { %v816_v44 = vsel %vm409_vm6, %v813_v13, %v815_v37  ;;  %v814_v5 = vsel %vm409_vm6, %v812_v24, %v813_v13  ;;  %v1828_v13 = vld [vmem:[%s2972_s2 + $0x40] sm:$0xff]  ;;  %v1835_v37 = vld [vmem:[%s2972_s2 + $0x68] sm:$0xff] }
 0x4a9   :  { %819 = vrot.lane.b32.xlu1 %v816_v44, %s1939_s27  ;;  %817 = vrot.lane.b32.xlu0 %v814_v5, %s1939_s27  ;;  %v1834_v24 = vld [vmem:[%s2972_s2 + $0x60] sm:$0xff]  ;;  %v1841_v44 = vld [vmem:[%s2972_s2 + $0x58] sm:$0xff] }
 0x4aa   :  { %v1840_v5 = vld [vmem:[%s2972_s2 + $0x50] sm:$0xff] }
 0x4ad   :  { %831 = vrot.lane.b32.xlu0 %v2401_v16, %s1937_s20 }
 0x51b   :  { %v2407_v38 = vpop.permute.xlu0 %817  ;;  %v2423_v39 = vpop.permute.xlu1 %819 }
 0x51f   :  { %v832_v43 = vpop.permute.xlu0 %831 }
 0x520   :  { %v834_v26 = vmul.f32 %v832_v43, %v2155_v41  ;;  %v835_v45 = vmul.f32 %v832_v43, %v2130_v15  ;;  %v836_v57 = vmul.f32 %v832_v43, %v2279_v46  ;;  %v1847_v43 = vld [vmem:[%s2972_s2 + $0x78] sm:$0xff] }
 0x522   :  { %v840_v21 = vrot.slane %v834_v26, 3  ;;  %v841_v28 = vrot.slane %v835_v45, 3  ;;  %v843_v1 = vrot.slane %v836_v57, 3  ;;  %v1846_v26 = vld [vmem:[%s2972_s2 + $0x70] sm:$0xff]  ;;  %v1854_v45 = vld [vmem:[%s2973_s0 + $0x1] ss:$0 sm:$0xff] }
 0x523   :  { %v2489_v57 = vld [vmem:[%s2973_s0] ss:$0 sm:$0xff] }
 0x524   :  { %v844_v51 = vsel %vm409_vm6, %v841_v28, %v843_v1  ;;  %v842_v58 = vsel %vm409_vm6, %v840_v21, %v841_v28  ;;  %v189_v21 = vmul.f32 %v2489_v57, %v2090_v47  ;;  %v190_v28 = vmul.f32 %v2489_v57, %v2092_v48 }
 0x525   :  { %847 = vrot.lane.b32.xlu0 %v844_v51, %s1940_s28  ;;  %845 = vrot.lane.b32.xlu1 %v842_v58, %s1940_s28  ;;  %v1786_v51 = vld [vmem:[%s2973_s0 + $0x10] ss:$0 sm:$0xff] }
 0x526   :  { %v191_v1 = vadd.f32 %v2339_v60, %v189_v21 }
 0x528   :  { %v212_v58 = vadd.f32 %v2222_v17, %v191_v1 }
 0x529   :  { %859 = vrot.lane.b32.xlu1 %v2419_v36, %s1936_s19 }
 0x597   :  { %v2425_v52 = vpop.permute.xlu1 %845 }
 0x59b   :  { %v860_v55 = vpop.permute.xlu1 %859 }
 0x59c   :  { %v862_v12 = vmul.f32 %v860_v55, %v2155_v41  ;;  %v863_v54 = vmul.f32 %v860_v55, %v2130_v15  ;;  %v864_v59 = vmul.f32 %v860_v55, %v2279_v46  ;;  %v192_v55 = vadd.f32 %v2339_v60, %v190_v28 }
 0x59e   :  { %v868_v3 = vrot.slane %v862_v12, 3  ;;  %v869_v23 = vrot.slane %v863_v54, 3  ;;  %v871_v4 = vrot.slane %v864_v59, 3  ;;  %v404_v12 = vmul.f32 %v1786_v51, %v2092_v48 }
 0x59f   :  { %v403_v54 = vmul.f32 %v1786_v51, %v2090_v47  ;;  %v213_v59 = vadd.f32 %v2183_v61, %v192_v55 }
 0x5a0   :  { %v872_v25 = vsel %vm409_vm6, %v869_v23, %v871_v4  ;;  %v870_v49 = vsel %vm409_vm6, %v868_v3, %v869_v23  ;;  %v233_v3 = vadd.f32 %v2185_v62, %v212_v58  ;;  %v405_v23 = vmul.f32 %v1786_v51, %v2114_v2 }
 0x5a1   :  { %875 = vrot.lane.b32.xlu1 %v872_v25, %s1941_s29  ;;  %873 = vrot.lane.b32.xlu0 %v870_v49, %s1941_s29  ;;  %v234_v4 = vadd.f32 %v2224_v18, %v213_v59  ;;  %v411_v49 = vrot.slane %v404_v12, 3 }
 0x5a2   :  { %v254_v25 = vadd.f32 %v2226_v19, %v233_v3 }
 0x5a3   :  { %v255_v17 = vadd.f32 %v2187_v63, %v234_v4 }
 0x5a5   :  { %898 = vrot.lane.b32.xlu1 %v1829_v56, %s1930_s15  ;;  %896 = vrot.lane.b32.xlu0 %v1828_v13, %s1930_s15  ;;  %v276_v48 = vadd.f32 %v2228_v20, %v255_v17  ;;  %v1796_v20 = vld [vmem:[%s2973_s0 + $0x18] ss:$0 sm:$0xff] }
 0x5a9   :  { %910 = vrot.lane.b32.xlu1 %v1829_v56, %s1929_s14  ;;  %908 = vrot.lane.b32.xlu0 %v1828_v13, %s1929_s14 }
 0x5ad   :  { %922 = vrot.lane.b32.xlu1 %v1829_v56, %s1931_s18  ;;  %920 = vrot.lane.b32.xlu0 %v1828_v13, %s1931_s18  ;;  %v410_v56 = vrot.slane %v403_v54, 3  ;;  %v275_v13 = vadd.f32 %v2189_v0, %v254_v25 }
 0x5af   :  { %v412_v47 = vsel %vm409_vm6, %v410_v56, %v411_v49 }
 0x5b0   :  { %v417_v61 = vadd.f32 %v412_v47, %v275_v13 }
 0x5b1   :  { %935 = vrot.lane.b32.xlu1 %v1835_v37, %s1932_s23  ;;  %933 = vrot.lane.b32.xlu0 %v1834_v24, %s1932_s23 }
 0x5b2   :  { %v445_v2 = vadd.f32 %v2248_v30, %v417_v61  ;;  %v540_v30 = vmul.f32 %v1796_v20, %v2155_v41 }
 0x5b5   :  { %947 = vrot.lane.b32.xlu1 %v1835_v37, %s1933_s24  ;;  %945 = vrot.lane.b32.xlu0 %v1834_v24, %s1933_s24 }
 0x5b9   :  { %959 = vrot.lane.b32.xlu1 %v1835_v37, %s1934_s25  ;;  %957 = vrot.lane.b32.xlu0 %v1834_v24, %s1934_s25  ;;  %v413_v37 = vrot.slane %v405_v23, 3 }
 0x5bb   :  { %v414_v62 = vsel %vm409_vm6, %v411_v49, %v413_v37 }
 0x5bc   :  { %v418_v24 = vadd.f32 %v414_v62, %v276_v48 }
 0x5bd   :  { %972 = vrot.lane.b32.xlu1 %v1841_v44, %s1930_s15  ;;  %970 = vrot.lane.b32.xlu0 %v1840_v5, %s1930_s15 }
 0x5be   :  { %v446_v18 = vadd.f32 %v2201_v7, %v418_v24  ;;  %v541_v7 = vmul.f32 %v1796_v20, %v2130_v15 }
 0x5c0   :  { %v474_v19 = vadd.f32 %v2250_v31, %v446_v18 }
 0x5c1   :  { %984 = vrot.lane.b32.xlu1 %v1841_v44, %s1929_s14  ;;  %982 = vrot.lane.b32.xlu0 %v1840_v5, %s1929_s14 }
 0x5c2   :  { %v502_v0 = vadd.f32 %v2205_v9, %v474_v19  ;;  %v1816_v9 = vld [vmem:[%s2973_s0 + $0x28] ss:$0 sm:$0xff] }
 0x5c5   :  { %996 = vrot.lane.b32.xlu1 %v1841_v44, %s1931_s18  ;;  %994 = vrot.lane.b32.xlu0 %v1840_v5, %s1931_s18  ;;  %v473_v44 = vadd.f32 %v2203_v8, %v445_v2 }
 0x5c7   :  { %v501_v63 = vadd.f32 %v2252_v32, %v473_v44 }
 0x5c9   :  { %1009 = vrot.lane.b32.xlu1 %v1847_v43, %s1932_s23  ;;  %1007 = vrot.lane.b32.xlu0 %v1846_v26, %s1932_s23  ;;  %v529_v5 = vadd.f32 %v2207_v10, %v501_v63  ;;  %v756_v10 = vmul.f32 %v1816_v9, %v2279_v46 }
 0x5cd   :  { %1021 = vrot.lane.b32.xlu1 %v1847_v43, %s1933_s24  ;;  %1019 = vrot.lane.b32.xlu0 %v1846_v26, %s1933_s24 }
 0x5d1   :  { %1033 = vrot.lane.b32.xlu1 %v1847_v43, %s1934_s25  ;;  %1031 = vrot.lane.b32.xlu0 %v1846_v26, %s1934_s25  ;;  %v530_v43 = vadd.f32 %v2254_v33, %v502_v0  ;;  %v542_v26 = vadd.f32 %v540_v30, %v529_v5  ;;  %v754_v33 = vmul.f32 %v1816_v9, %v2155_v41 }
 0x5d3   :  { %v543_v31 = vadd.f32 %v541_v7, %v530_v43  ;;  %v563_v32 = vadd.f32 %v2246_v29, %v542_v26  ;;  %v763_v29 = vrot.slane %v756_v10, 3  ;;  %v760_v58 = vrot.slane %v754_v33, 3  ;;  %v1857_v10 = vld [vmem:[%s2973_s0 + $0x4] ss:$0 sm:$0xff]  ;;  %v1875_v33 = vld [vmem:[%s2973_s0 + $0x13] ss:$0 sm:$0xff] }
 0x5d5   :  { %1064 = vrot.lane.b32.xlu0 %v1854_v45, %s1935_s11  ;;  %v564_v8 = vadd.f32 %v2199_v6, %v543_v31  ;;  %v755_v45 = vmul.f32 %v1816_v9, %v2130_v15  ;;  %v584_v28 = vadd.f32 %v2209_v11, %v563_v32  ;;  %v1856_v32 = vld [vmem:[%s2973_s0 + $0x3] ss:$0 sm:$0xff]  ;;  %v1855_v9 = vld [vmem:[%s2973_s0 + $0x2] ss:$0 sm:$0xff] }
 0x5d7   :  { %v585_v21 = vadd.f32 %v2256_v34, %v564_v8  ;;  %v605_v6 = vadd.f32 %v2258_v35, %v584_v28  ;;  %v761_v51 = vrot.slane %v755_v45, 3  ;;  %v1871_v45 = vld [vmem:[%s2973_s0 + $0x11] ss:$0 sm:$0xff]  ;;  %v1877_v28 = vld [vmem:[%s2973_s0 + $0x14] ss:$0 sm:$0xff] }
 0x5d9   :  { %v606_v1 = vadd.f32 %v2271_v40, %v585_v21  ;;  %v626_v12 = vadd.f32 %v2273_v42, %v605_v6  ;;  %v764_v15 = vsel %vm409_vm6, %v761_v51, %v763_v29  ;;  %v762_v46 = vsel %vm409_vm6, %v760_v58, %v761_v51  ;;  %v848_v40 = vpop.permute.xlu0 %847  ;;  %v1873_v21 = vld [vmem:[%s2973_s0 + $0x12] ss:$0 sm:$0xff]  ;;  %v1881_v58 = vld [vmem:[%s2973_s0 + $0x19] ss:$0 sm:$0xff] }
 0x5db   :  { %v627_v55 = vadd.f32 %v2329_v50, %v606_v1  ;;  %v767_v54 = vadd.f32 %v762_v46, %v626_v12  ;;  %v1883_v12 = vld [vmem:[%s2973_s0 + $0x1a] ss:$0 sm:$0xff]  ;;  %v1865_v46 = vld [vmem:[%s2973_s0 + $0xb] ss:$0 sm:$0xff] }
 0x5dd   :  { %v768_v41 = vadd.f32 %v764_v15, %v627_v55  ;;  %v795_v11 = vadd.f32 %v2389_v22, %v767_v54  ;;  %v1861_v55 = vld [vmem:[%s2973_s0 + $0x9] ss:$0 sm:$0xff]  ;;  %v1863_v15 = vld [vmem:[%s2973_s0 + $0xa] ss:$0 sm:$0xff]  ;;  %v2988_v54 = vld [vmem:[#allocation3_spill] sm:$0xff] }
 0x5df   :  { %v796_v34 = vadd.f32 %v2405_v27, %v768_v41  ;;  %v823_v59 = vadd.f32 %v2407_v38, %v795_v11  ;;  %v1867_v41 = vld [vmem:[%s2973_s0 + $0xc] ss:$0 sm:$0xff] }
 0x5e1   :  { %v824_v35 = vadd.f32 %v2423_v39, %v796_v34  ;;  %v851_v50 = vadd.f32 %v2425_v52, %v823_v59  ;;  %v2989_v34 = vld [vmem:[#allocation8_spill] sm:$0xff]  ;;  %v2992_v59 = vld [vmem:[#allocation7_spill] sm:$0xff] }
 0x5e3   :  { %v852_v3 = vadd.f32 %v848_v40, %v824_v35  ;;  %v2991_v40 = vld [vmem:[#allocation5_spill] sm:$0xff] }
 0x613   :  { %v876_v42 = vpop.permute.xlu1 %875  ;;  %v874_v23 = vpop.permute.xlu0 %873 }
 0x614   :  { %v880_v4 = vadd.f32 %v876_v42, %v852_v3  ;;  %v879_v25 = vadd.f32 %v874_v23, %v851_v50 }
 0x616   :  { %884 = vst.msk [vmem:[%s2975_s3 + $0x8] sm:$0x7f] %vm883_vm10, %v880_v4 }
 0x617   :  { %882 = vst.msk [vmem:[%s2975_s3] sm:$0xff] %vm881_vm7, %v879_v25  ;;  %v899_v22 = vpop.permute.xlu1 %898  ;;  %v897_v27 = vpop.permute.xlu0 %896 }
 0x618   :  { %903 = vst.msk [vmem:[#allocation2 + $0x9] sm:$0xff] %vm30_vm0, %v899_v22  ;;  %902 = vst.msk [vmem:[#allocation2 + $0x1] sm:$0xff] %vm30_vm0, %v897_v27 }
 0x61b   :  { %v911_v38 = vpop.permute.xlu1 %910  ;;  %v909_v39 = vpop.permute.xlu0 %908 }
 0x61c   :  { %915 = vst.msk [vmem:[#allocation2 + $0x9] sm:$0xff] %vm43_vm1, %v911_v38  ;;  %914 = vst.msk [vmem:[#allocation2 + $0x1] sm:$0xff] %vm43_vm1, %v909_v39 }
 0x61f   :  { %v923_v52 = vpop.permute.xlu1 %922  ;;  %v921_v49 = vpop.permute.xlu0 %920 }
 0x620   :  { %927 = vst.msk [vmem:[#allocation2 + $0x9] sm:$0xff] %vm56_vm2, %v923_v52  ;;  %926 = vst.msk [vmem:[#allocation2 + $0x1] sm:$0xff] %vm56_vm2, %v921_v49 }
 0x623   :  { %v936_v56 = vpop.permute.xlu1 %935  ;;  %v934_v17 = vpop.permute.xlu0 %933 }
 0x624   :  { %940 = vst.msk [vmem:[#allocation2 + $0x9] sm:$0xff] %vm70_vm3, %v936_v56  ;;  %939 = vst.msk [vmem:[#allocation2 + $0x1] sm:$0xff] %vm70_vm3, %v934_v17 }
 0x627   :  { %v948_v13 = vpop.permute.xlu1 %947  ;;  %v946_v37 = vpop.permute.xlu0 %945 }
 0x628   :  { %952 = vst.msk [vmem:[#allocation2 + $0x9] sm:$0xff] %vm83_vm4, %v948_v13  ;;  %951 = vst.msk [vmem:[#allocation2 + $0x1] sm:$0xff] %vm83_vm4, %v946_v37 }
 0x62b   :  { %v960_v48 = vpop.permute.xlu1 %959  ;;  %v958_v47 = vpop.permute.xlu0 %957 }
 0x62c   :  { %964 = vst.msk [vmem:[#allocation2 + $0x9] sm:$0xff] %vm96_vm5, %v960_v48  ;;  %963 = vst.msk [vmem:[#allocation2 + $0x1] sm:$0xff] %vm96_vm5, %v958_v47 }
 0x62f   :  { %v973_v61 = vpop.permute.xlu1 %972  ;;  %v971_v62 = vpop.permute.xlu0 %970 }
 0x630   :  { %977 = vst.msk [vmem:[#allocation2 + $0x21] sm:$0xff] %vm30_vm0, %v973_v61  ;;  %976 = vst.msk [vmem:[#allocation2 + $0x19] sm:$0xff] %vm30_vm0, %v971_v62 }
 0x633   :  { %v985_v24 = vpop.permute.xlu1 %984  ;;  %v983_v2 = vpop.permute.xlu0 %982  ;;  %v2579_v30 = vld [vmem:[#allocation2] sm:$0xff]  ;;  %v2581_v7 = vld [vmem:[#allocation2 + $0x8] sm:$0xff] }
 0x634   :  { %989 = vst.msk [vmem:[#allocation2 + $0x21] sm:$0xff] %vm43_vm1, %v985_v24  ;;  %988 = vst.msk [vmem:[#allocation2 + $0x19] sm:$0xff] %vm43_vm1, %v983_v2  ;;  %v1055_v25 = vmul.f32 %v2489_v57, %v2581_v7  ;;  %v1054_v22 = vmul.f32 %v2489_v57, %v2579_v30 }
 0x636   :  { %v1057_v39 = vadd.f32 %v2339_v60, %v1055_v25  ;;  %v1056_v52 = vadd.f32 %v2339_v60, %v1054_v22 }
 0x637   :  { %v997_v18 = vpop.permute.xlu1 %996  ;;  %v995_v19 = vpop.permute.xlu0 %994 }
 0x638   :  { %1001 = vst.msk [vmem:[#allocation2 + $0x21] sm:$0xff] %vm56_vm2, %v997_v18  ;;  %1000 = vst.msk [vmem:[#allocation2 + $0x19] sm:$0xff] %vm56_vm2, %v995_v19  ;;  %v2689_v18 = vld [vmem:[#allocation2 + $0x10] sm:$0x3] }
 0x63b   :  { %v1010_v44 = vpop.permute.xlu1 %1009  ;;  %v1008_v63 = vpop.permute.xlu0 %1007 }
 0x63c   :  { %1014 = vst.msk [vmem:[#allocation2 + $0x21] sm:$0xff] %vm70_vm3, %v1010_v44  ;;  %1013 = vst.msk [vmem:[#allocation2 + $0x19] sm:$0xff] %vm70_vm3, %v1008_v63 }
 0x63f   :  { %v1022_v0 = vpop.permute.xlu1 %1021  ;;  %v1020_v20 = vpop.permute.xlu0 %1019 }
 0x640   :  { %1026 = vst.msk [vmem:[#allocation2 + $0x21] sm:$0xff] %vm83_vm4, %v1022_v0  ;;  %1025 = vst.msk [vmem:[#allocation2 + $0x19] sm:$0xff] %vm83_vm4, %v1020_v20 }
 0x643   :  { %v1034_v5 = vpop.permute.xlu1 %1033  ;;  %v1032_v43 = vpop.permute.xlu0 %1031 }
 0x644   :  { %1038 = vst.msk [vmem:[#allocation2 + $0x21] sm:$0xff] %vm96_vm5, %v1034_v5  ;;  %1037 = vst.msk [vmem:[#allocation2 + $0x19] sm:$0xff] %vm96_vm5, %v1032_v43 }
 0x647   :  { %v1065_v26 = vpop.permute.xlu0 %1064 }
 0x648   :  { %v1067_v31 = vmul.f32 %v1065_v26, %v2579_v30  ;;  %v1068_v8 = vmul.f32 %v1065_v26, %v2581_v7 }
 0x64a   :  { %1073 = vrot.lane.b32.xlu0 %v1068_v8, %s1938_s26  ;;  %1071 = vrot.lane.b32.xlu1 %v1067_v31, %s1938_s26 }
 0x64b   :  { %v2743_v25 = vld [vmem:[#allocation2 + $0x18] sm:$0xff] }
 0x64e   :  { %1106 = vrot.lane.b32.xlu0 %v1856_v32, %s1937_s20  ;;  %1085 = vrot.lane.b32.xlu1 %v1855_v9, %s1930_s15 }
 0x652   :  { %1287 = vrot.lane.b32.xlu0 %v1871_v45, %s1935_s11  ;;  %1127 = vrot.lane.b32.xlu1 %v1857_v10, %s1936_s19 }
 0x656   :  { %1343 = vrot.lane.b32.xlu0 %v1875_v33, %s1937_s20  ;;  %1315 = vrot.lane.b32.xlu1 %v1873_v21, %s1930_s15 }
 0x65a   :  { %1371 = vrot.lane.b32.xlu1 %v1877_v28, %s1936_s19 }
 0x6bc   :  { %v1072_v1 = vpop.permute.xlu1 %1071  ;;  %v1074_v11 = vpop.permute.xlu0 %1073 }
 0x6bd   :  { %v1078_v49 = vadd.f32 %v1074_v11, %v1057_v39  ;;  %v1077_v56 = vadd.f32 %v1072_v1, %v1056_v52  ;;  %v2754_v52 = vld [vmem:[#allocation2 + $0x20] sm:$0xff] }
 0x6c0   :  { %v1086_v6 = vpop.permute.xlu1 %1085  ;;  %v1107_v35 = vpop.permute.xlu0 %1106 }
 0x6c1   :  { %v1088_v51 = vmul.f32 %v1086_v6, %v2579_v30  ;;  %v1089_v29 = vmul.f32 %v1086_v6, %v2581_v7  ;;  %v1109_v3 = vmul.f32 %v1107_v35, %v2579_v30 }
 0x6c3   :  { %1094 = vrot.lane.b32.xlu1 %v1089_v29, %s1939_s27  ;;  %1092 = vrot.lane.b32.xlu0 %v1088_v51, %s1939_s27 }
 0x6c4   :  { %v1128_v50 = vpop.permute.xlu1 %1127  ;;  %v1288_v23 = vpop.permute.xlu0 %1287 }
 0x6c5   :  { %v1131_v42 = vmul.f32 %v1128_v50, %v2581_v7  ;;  %v1290_v24 = vmul.f32 %v1288_v23, %v2579_v30  ;;  %v1291_v2 = vmul.f32 %v1288_v23, %v2581_v7  ;;  %v1292_v63 = vmul.f32 %v1288_v23, %v2689_v18 }
 0x6c7   :  { %1411 = vrot.lane.b32.xlu1 %v1881_v58, %s1935_s11  ;;  %1159 = vrot.lane.b32.xlu0 %v1861_v55, %s1935_s11  ;;  %v1296_v5 = vrot.slane %v1290_v24, 3  ;;  %v1297_v43 = vrot.slane %v1291_v2, 3  ;;  %v1299_v9 = vrot.slane %v1292_v63, 3 }
 0x6c8   :  { %v1316_v4 = vpop.permute.xlu1 %1315  ;;  %v1344_v27 = vpop.permute.xlu0 %1343 }
 0x6c9   :  { %v1318_v26 = vmul.f32 %v1316_v4, %v2579_v30  ;;  %v1319_v31 = vmul.f32 %v1316_v4, %v2581_v7  ;;  %v1346_v45 = vmul.f32 %v1344_v27, %v2579_v30  ;;  %v1347_v10 = vmul.f32 %v1344_v27, %v2581_v7 }
 0x6ca   :  { %v1320_v21 = vmul.f32 %v1316_v4, %v2689_v18  ;;  %v1298_v6 = vsel %vm409_vm6, %v1296_v5, %v1297_v43  ;;  %v1348_v58 = vmul.f32 %v1344_v27, %v2689_v18 }
 0x6cb   :  { %1432 = vrot.lane.b32.xlu1 %v1883_v12, %s1930_s15  ;;  %1186 = vrot.lane.b32.xlu0 %v1863_v15, %s1930_s15  ;;  %v1324_v28 = vrot.slane %v1318_v26, 3  ;;  %v1325_v1 = vrot.slane %v1319_v31, 3  ;;  %v1352_v55 = vrot.slane %v1346_v45, 3  ;;  %v1353_v12 = vrot.slane %v1347_v10, 3 }
 0x6cc   :  { %v1372_v38 = vpop.permute.xlu1 %1371  ;;  %v1300_v15 = vsel %vm409_vm6, %v1297_v43, %v1299_v9 }
 0x6cf   :  { %1453 = vrot.lane.b32.xlu1 %v2170_v53, %s1937_s20  ;;  %1213 = vrot.lane.b32.xlu0 %v1865_v46, %s1937_s20  ;;  %v2990_v53 = vld [vmem:[#allocation4_spill] sm:$0xff]  ;;  %v1327_v46 = vrot.slane %v1320_v21, 3 }
 0x6d3   :  { %1474 = vrot.lane.b32.xlu1 %v2988_v54, %s1936_s19  ;;  %1240 = vrot.lane.b32.xlu0 %v1867_v41, %s1936_s19  ;;  %v1374_v41 = vmul.f32 %v1372_v38, %v2579_v30  ;;  %v1375_v54 = vmul.f32 %v1372_v38, %v2581_v7 }
 0x6d7   :  { %1662 = vrot.lane.b32.xlu1 %v2385_v14, %s1930_s15  ;;  %1634 = vrot.lane.b32.xlu0 %v2989_v34, %s1935_s11  ;;  %v2993_v14 = vld [vmem:[#allocation6_spill] sm:$0xff]  ;;  %v1326_v34 = vsel %vm409_vm6, %v1324_v28, %v1325_v1 }
 0x6db   :  { %1690 = vrot.lane.b32.xlu1 %v2401_v16, %s1937_s20  ;;  %1506 = vrot.lane.b32.xlu0 %v2990_v53, %s1935_s11  ;;  %v1110_v16 = vmul.f32 %v1107_v35, %v2581_v7  ;;  %v1376_v35 = vmul.f32 %v1372_v38, %v2689_v18 }
 0x6df   :  { %1718 = vrot.lane.b32.xlu1 %v2419_v36, %s1936_s19  ;;  %1533 = vrot.lane.b32.xlu0 %v2991_v40, %s1930_s15  ;;  %v1130_v36 = vmul.f32 %v1128_v50, %v2579_v30  ;;  %v1355_v40 = vrot.slane %v1348_v58, 3 }
 0x6e1   :  { %v1356_v23 = vsel %vm409_vm6, %v1353_v12, %v1355_v40 }
 0x6e3   :  { %1587 = vrot.lane.b32.xlu1 %v2992_v59, %s1936_s19  ;;  %1560 = vrot.lane.b32.xlu0 %v2993_v14, %s1937_s20  ;;  %v1380_v59 = vrot.slane %v1374_v41, 3  ;;  %v1381_v14 = vrot.slane %v1375_v54, 3 }
 0x6e5   :  { %v1382_v4 = vsel %vm409_vm6, %v1380_v59, %v1381_v14 }
 0x6e7   :  { %1115 = vrot.lane.b32.xlu1 %v1110_v16, %s1940_s28  ;;  %1113 = vrot.lane.b32.xlu0 %v1109_v3, %s1940_s28  ;;  %v1328_v3 = vsel %vm409_vm6, %v1325_v1, %v1327_v46  ;;  %v1354_v16 = vsel %vm409_vm6, %v1352_v55, %v1353_v12 }
 0x6eb   :  { %1136 = vrot.lane.b32.xlu1 %v1131_v42, %s1941_s29  ;;  %1134 = vrot.lane.b32.xlu0 %v1130_v36, %s1941_s29  ;;  %v1383_v42 = vrot.slane %v1376_v35, 3 }
 0x6ed   :  { %v1384_v39 = vsel %vm409_vm6, %v1381_v14, %v1383_v42 }
 0x735   :  { %v1093_v17 = vpop.permute.xlu0 %1092  ;;  %v1095_v13 = vpop.permute.xlu1 %1094 }
 0x736   :  { %v2677_v37 = vadd.f32 %v1093_v17, %v1077_v56  ;;  %v2679_v48 = vadd.f32 %v1095_v13, %v1078_v49 }
 0x739   :  { %v1160_v47 = vpop.permute.xlu0 %1159  ;;  %v2681_v61 = vpop.permute.xlu1 %1411 }
 0x73a   :  { %v1162_v62 = vmul.f32 %v1160_v47, %v2579_v30  ;;  %v1163_v57 = vmul.f32 %v1160_v47, %v2581_v7  ;;  %v1164_v0 = vmul.f32 %v1160_v47, %v2689_v18  ;;  %v1414_v38 = vmul.f32 %v2681_v61, %v2743_v25 }
 0x73b   :  { %v1415_v17 = vmul.f32 %v2681_v61, %v2754_v52 }
 0x73c   :  { %1170 = vrot.lane.b32.xlu1 %v1163_v57, %s1938_s26  ;;  %1168 = vrot.lane.b32.xlu0 %v1162_v62, %s1938_s26 }
 0x73d   :  { %v2691_v19 = vpop.permute.xlu0 %1186  ;;  %v2693_v44 = vpop.permute.xlu1 %1432 }
 0x73e   :  { %v1189_v20 = vmul.f32 %v2691_v19, %v2579_v30  ;;  %v1190_v33 = vmul.f32 %v2691_v19, %v2581_v7  ;;  %v1191_v13 = vmul.f32 %v2691_v19, %v2689_v18  ;;  %v1435_v57 = vmul.f32 %v2693_v44, %v2743_v25 }
 0x73f   :  { %v1436_v24 = vmul.f32 %v2693_v44, %v2754_v52 }
 0x740   :  { %1195 = vrot.lane.b32.xlu1 %v1189_v20, %s1939_s27  ;;  %1172 = vrot.lane.b32.xlu0 %v1164_v0, %s1938_s26 }
 0x741   :  { %v2703_v8 = vpop.permute.xlu0 %1213  ;;  %v2705_v32 = vpop.permute.xlu1 %1453 }
 0x742   :  { %v1216_v0 = vmul.f32 %v2703_v8, %v2579_v30  ;;  %v1217_v20 = vmul.f32 %v2703_v8, %v2581_v7  ;;  %v1457_v44 = vmul.f32 %v2705_v32, %v2754_v52 }
 0x744   :  { %1301 = vrot.lane.b32.xlu1 %v1298_v6, %s1938_s26  ;;  %1197 = vrot.lane.b32.xlu0 %v1190_v33, %s1939_s27  ;;  %v2812_v33 = vld [vmem:[#allocation2 + $0x28] sm:$0x3] }
 0x745   :  { %v2715_v51 = vpop.permute.xlu0 %1240  ;;  %v2717_v29 = vpop.permute.xlu1 %1474 }
 0x746   :  { %v1243_v26 = vmul.f32 %v2715_v51, %v2579_v30  ;;  %v1244_v31 = vmul.f32 %v2715_v51, %v2581_v7  ;;  %v1478_v9 = vmul.f32 %v2717_v29, %v2754_v52 }
 0x748   :  { %1303 = vrot.lane.b32.xlu0 %v1300_v15, %s1938_s26  ;;  %1329 = vrot.lane.b32.xlu1 %v1326_v34, %s1939_s27 }
 0x749   :  { %v2726_v53 = vpop.permute.xlu0 %1634  ;;  %v2728_v11 = vpop.permute.xlu1 %1662 }
 0x74a   :  { %v1637_v45 = vmul.f32 %v2726_v53, %v2743_v25  ;;  %v1638_v10 = vmul.f32 %v2726_v53, %v2754_v52  ;;  %v1639_v1 = vmul.f32 %v2726_v53, %v2812_v33  ;;  %v1665_v15 = vmul.f32 %v2728_v11, %v2743_v25 }
 0x74b   :  { %v1666_v46 = vmul.f32 %v2728_v11, %v2754_v52  ;;  %v1667_v41 = vmul.f32 %v2728_v11, %v2812_v33 }
 0x74c   :  { %1331 = vrot.lane.b32.xlu0 %v1328_v3, %s1939_s27  ;;  %1357 = vrot.lane.b32.xlu1 %v1354_v16, %s1940_s28  ;;  %v1643_v6 = vrot.slane %v1637_v45, 3  ;;  %v1646_v58 = vrot.slane %v1639_v1, 3  ;;  %v1671_v40 = vrot.slane %v1665_v15, 3 }
 0x74d   :  { %v2735_v50 = vpop.permute.xlu0 %1506  ;;  %v2737_v36 = vpop.permute.xlu1 %1690  ;;  %v1672_v35 = vrot.slane %v1666_v46, 3  ;;  %v1674_v59 = vrot.slane %v1667_v41, 3 }
 0x74e   :  { %v1509_v21 = vmul.f32 %v2735_v50, %v2743_v25  ;;  %v1510_v28 = vmul.f32 %v2735_v50, %v2754_v52  ;;  %v1693_v11 = vmul.f32 %v2737_v36, %v2743_v25  ;;  %v1694_v14 = vmul.f32 %v2737_v36, %v2754_v52 }
 0x74f   :  { %v1675_v3 = vsel %vm409_vm6, %v1672_v35, %v1674_v59  ;;  %v1673_v16 = vsel %vm409_vm6, %v1671_v40, %v1672_v35 }
 0x750   :  { %1359 = vrot.lane.b32.xlu0 %v1356_v23, %s1940_s28  ;;  %1385 = vrot.lane.b32.xlu1 %v1382_v4, %s1941_s29  ;;  %v1695_v23 = vmul.f32 %v2737_v36, %v2812_v33  ;;  %v1699_v4 = vrot.slane %v1693_v11, 3 }
 0x751   :  { %v2745_v22 = vpop.permute.xlu0 %1533  ;;  %v2747_v27 = vpop.permute.xlu1 %1718 }
 0x752   :  { %v1536_v12 = vmul.f32 %v2745_v22, %v2743_v25  ;;  %v1537_v34 = vmul.f32 %v2745_v22, %v2754_v52  ;;  %v1538_v53 = vmul.f32 %v2745_v22, %v2812_v33  ;;  %v1700_v22 = vrot.slane %v1694_v14, 3 }
 0x753   :  { %v1721_v36 = vmul.f32 %v2747_v27, %v2743_v25 }
 0x754   :  { %1387 = vrot.lane.b32.xlu0 %v1384_v39, %s1941_s29  ;;  %1418 = vrot.lane.b32.xlu1 %v1414_v38, %s1938_s26  ;;  %v1702_v39 = vrot.slane %v1695_v23, 3 }
 0x755   :  { %v2756_v49 = vpop.permute.xlu0 %1560  ;;  %v2758_v56 = vpop.permute.xlu1 %1587 }
 0x756   :  { %v1564_v42 = vmul.f32 %v2756_v49, %v2754_v52  ;;  %v1565_v38 = vmul.f32 %v2756_v49, %v2812_v33 }
 0x758   :  { %1420 = vrot.lane.b32.xlu0 %v1415_v17, %s1938_s26  ;;  %1199 = vrot.lane.b32.xlu1 %v1191_v13, %s1939_s27  ;;  %v1701_v17 = vsel %vm409_vm6, %v1699_v4, %v1700_v22  ;;  %v1590_v13 = vmul.f32 %v2758_v56, %v2743_v25 }
 0x759   :  { %v1114_v47 = vpop.permute.xlu0 %1113  ;;  %v1116_v62 = vpop.permute.xlu1 %1115 }
 0x75a   :  { %v1119_v2 = vadd.f32 %v1114_v47, %v2677_v37  ;;  %v1120_v63 = vadd.f32 %v1116_v62, %v2679_v48  ;;  %v1218_v37 = vmul.f32 %v2703_v8, %v2689_v18  ;;  %v1456_v48 = vmul.f32 %v2705_v32, %v2743_v25 }
 0x75b   :  { %v1245_v8 = vmul.f32 %v2715_v51, %v2689_v18  ;;  %v1477_v32 = vmul.f32 %v2717_v29, %v2743_v25  ;;  %v1644_v51 = vrot.slane %v1638_v10, 3  ;;  %v1511_v29 = vmul.f32 %v2735_v50, %v2812_v33 }
 0x75c   :  { %1441 = vrot.lane.b32.xlu1 %v1436_v24, %s1939_s27  ;;  %1439 = vrot.lane.b32.xlu0 %v1435_v57, %s1939_s27  ;;  %v1563_v50 = vmul.f32 %v2756_v49, %v2743_v25  ;;  %v1722_v47 = vmul.f32 %v2747_v27, %v2754_v52  ;;  %v1723_v62 = vmul.f32 %v2747_v27, %v2812_v33 }
 0x75d   :  { %v1135_v61 = vpop.permute.xlu0 %1134  ;;  %v1137_v19 = vpop.permute.xlu1 %1136  ;;  %v1645_v55 = vsel %vm409_vm6, %v1643_v6, %v1644_v51  ;;  %v1647_v54 = vsel %vm409_vm6, %v1644_v51, %v1646_v58  ;;  %v1703_v49 = vsel %vm409_vm6, %v1700_v22, %v1702_v39  ;;  %v1591_v57 = vmul.f32 %v2758_v56, %v2754_v52 }
 0x75e   :  { %v2778_v5 = vadd.f32 %v1135_v61, %v1119_v2  ;;  %v2780_v43 = vadd.f32 %v1137_v19, %v1120_v63  ;;  %v1592_v24 = vmul.f32 %v2758_v56, %v2812_v33  ;;  %v1727_v2 = vrot.slane %v1721_v36, 3 }
 0x75f   :  { %v1728_v63 = vrot.slane %v1722_v47, 3  ;;  %v1730_v61 = vrot.slane %v1723_v62, 3 }
 0x760   :  { %1224 = vrot.lane.b32.xlu1 %v1217_v20, %s1940_s28  ;;  %1222 = vrot.lane.b32.xlu0 %v1216_v0, %s1940_s28  ;;  %v1859_v0 = vld [vmem:[%s2973_s0 + $0x8] ss:$0 sm:$0xff] }
 0x761   :  { %v1729_v27 = vsel %vm409_vm6, %v1727_v2, %v1728_v63  ;;  %v1731_v19 = vsel %vm409_vm6, %v1728_v63, %v1730_v61  ;;  %v1147_v56 = vmul.f32 %v1859_v0, %v2579_v30 }
 0x764   :  { %1226 = vrot.lane.b32.xlu0 %v1218_v37, %s1940_s28  ;;  %1460 = vrot.lane.b32.xlu1 %v1456_v48, %s1940_s28  ;;  %v1150_v48 = vadd.f32 %v2339_v60, %v1147_v56 }
 0x768   :  { %1462 = vrot.lane.b32.xlu0 %v1457_v44, %s1940_s28  ;;  %1249 = vrot.lane.b32.xlu1 %v1243_v26, %s1941_s29  ;;  %v1148_v44 = vmul.f32 %v1859_v0, %v2581_v7 }
 0x76c   :  { %1251 = vrot.lane.b32.xlu0 %v1244_v31, %s1941_s29  ;;  %1253 = vrot.lane.b32.xlu1 %v1245_v8, %s1941_s29 }
 0x770   :  { %1483 = vrot.lane.b32.xlu1 %v1478_v9, %s1941_s29  ;;  %1481 = vrot.lane.b32.xlu0 %v1477_v32, %s1941_s29  ;;  %v1927_v32 = vld [vmem:[%s2974_s1] ss:$0 sm:$0xff] }
 0x771   :  { %v1151_v9 = vadd.f32 %v1927_v32, %v1148_v44 }
 0x774   :  { %1517 = vrot.lane.b32.xlu1 %v1510_v28, %s1938_s26  ;;  %1515 = vrot.lane.b32.xlu0 %v1509_v21, %s1938_s26 }
 0x778   :  { %1648 = vrot.lane.b32.xlu1 %v1645_v55, %s1938_s26  ;;  %1519 = vrot.lane.b32.xlu0 %v1511_v29, %s1938_s26 }
 0x77c   :  { %1542 = vrot.lane.b32.xlu1 %v1536_v12, %s1939_s27  ;;  %1650 = vrot.lane.b32.xlu0 %v1647_v54, %s1938_s26 }
 0x780   :  { %1546 = vrot.lane.b32.xlu1 %v1538_v53, %s1939_s27  ;;  %1544 = vrot.lane.b32.xlu0 %v1537_v34, %s1939_s27 }
 0x784   :  { %1678 = vrot.lane.b32.xlu1 %v1675_v3, %s1939_s27  ;;  %1676 = vrot.lane.b32.xlu0 %v1673_v16, %s1939_s27  ;;  %v1869_v3 = vld [vmem:[%s2973_s0 + $0x10] ss:$0 sm:$0xff] }
 0x785   :  { %v1267_v23 = vmul.f32 %v1869_v3, %v2581_v7  ;;  %v1268_v4 = vmul.f32 %v1869_v3, %v2689_v18 }
 0x788   :  { %1571 = vrot.lane.b32.xlu1 %v1564_v42, %s1940_s28  ;;  %1569 = vrot.lane.b32.xlu0 %v1563_v50, %s1940_s28  ;;  %v1266_v42 = vmul.f32 %v1869_v3, %v2579_v30 }
 0x78a   :  { %v1272_v39 = vrot.slane %v1266_v42, 3 }
 0x78c   :  { %1573 = vrot.lane.b32.xlu0 %v1565_v38, %s1940_s28  ;;  %1704 = vrot.lane.b32.xlu1 %v1701_v17, %s1940_s28  ;;  %v1273_v17 = vrot.slane %v1267_v23, 3 }
 0x78e   :  { %v1274_v62 = vsel %vm409_vm6, %v1272_v39, %v1273_v17 }
 0x790   :  { %1706 = vrot.lane.b32.xlu0 %v1703_v49, %s1940_s28  ;;  %1596 = vrot.lane.b32.xlu1 %v1590_v13, %s1941_s29  ;;  %v1275_v13 = vrot.slane %v1268_v4, 3  ;;  %v1279_v49 = vadd.f32 %v1274_v62, %v2778_v5  ;;  %v1879_v5 = vld [vmem:[%s2973_s0 + $0x18] ss:$0 sm:$0xff] }
 0x794   :  { %1598 = vrot.lane.b32.xlu0 %v1591_v57, %s1941_s29  ;;  %1600 = vrot.lane.b32.xlu1 %v1592_v24, %s1941_s29  ;;  %v1276_v57 = vsel %vm409_vm6, %v1273_v17, %v1275_v13 }
 0x795   :  { %v1280_v30 = vadd.f32 %v1276_v57, %v2780_v43 }
 0x798   :  { %1732 = vrot.lane.b32.xlu0 %v1729_v27, %s1941_s29  ;;  %1734 = vrot.lane.b32.xlu1 %v1731_v19, %s1941_s29 }
 0x7ae   :  { %v1169_v20 = vpop.permute.xlu0 %1168  ;;  %v1171_v37 = vpop.permute.xlu1 %1170 }
 0x7af   :  { %v1177_v26 = vadd.f32 %v1169_v20, %v1150_v48  ;;  %v1178_v10 = vadd.f32 %v1171_v37, %v1151_v9  ;;  %v1149_v37 = vmul.f32 %v1859_v0, %v2689_v18  ;;  %v1889_v18 = vld [vmem:[%s2973_s0 + $0x20] ss:$0 sm:$0xff]  ;;  %v1899_v0 = vld [vmem:[%s2973_s0 + $0x28] ss:$0 sm:$0xff] }
 0x7b0   :  { %v1494_v3 = vmul.f32 %v1889_v18, %v2743_v25  ;;  %v1613_v42 = vmul.f32 %v1899_v0, %v2743_v25  ;;  %v1614_v23 = vmul.f32 %v1899_v0, %v2754_v52  ;;  %v1615_v39 = vmul.f32 %v1899_v0, %v2812_v33 }
 0x7b2   :  { %v2892_v31 = vpop.permute.xlu0 %1172  ;;  %v1196_v8 = vpop.permute.xlu1 %1195 }
 0x7b3   :  { %v1204_v45 = vadd.f32 %v1196_v8, %v1177_v26  ;;  %v1401_v26 = vmul.f32 %v1879_v5, %v2743_v25  ;;  %v1495_v25 = vmul.f32 %v1889_v18, %v2754_v52 }
 0x7b6   :  { %v1198_v21 = vpop.permute.xlu0 %1197  ;;  %v1302_v28 = vpop.permute.xlu1 %1301 }
 0x7b7   :  { %v2897_v1 = vadd.f32 %v1198_v21, %v1178_v10  ;;  %v1307_v7 = vadd.f32 %v1302_v28, %v1279_v49  ;;  %v1152_v10 = vadd.f32 %v1927_v32, %v1149_v37  ;;  %v1402_v21 = vmul.f32 %v1879_v5, %v2754_v52 }
 0x7ba   :  { %v1304_v6 = vpop.permute.xlu0 %1303  ;;  %v1330_v51 = vpop.permute.xlu1 %1329 }
 0x7bb   :  { %v1308_v63 = vadd.f32 %v1304_v6, %v1280_v30  ;;  %v1335_v61 = vadd.f32 %v1330_v51, %v1307_v7  ;;  %v1179_v6 = vadd.f32 %v2892_v31, %v1152_v10  ;;  %v1622_v30 = vrot.slane %v1615_v39, 3 }
 0x7be   :  { %v1332_v60 = vpop.permute.xlu0 %1331  ;;  %v1358_v29 = vpop.permute.xlu1 %1357 }
 0x7bf   :  { %v1336_v27 = vadd.f32 %v1332_v60, %v1308_v63  ;;  %v1363_v19 = vadd.f32 %v1358_v29, %v1335_v61 }
 0x7c2   :  { %v1360_v58 = vpop.permute.xlu0 %1359  ;;  %v1386_v55 = vpop.permute.xlu1 %1385 }
 0x7c3   :  { %v1364_v48 = vadd.f32 %v1360_v58, %v1336_v27  ;;  %v1391_v44 = vadd.f32 %v1386_v55, %v1363_v19 }
 0x7c5   :  { %v1403_v28 = vadd.f32 %v1401_v26, %v1391_v44 }
 0x7c6   :  { %v1388_v12 = vpop.permute.xlu0 %1387  ;;  %v1419_v15 = vpop.permute.xlu1 %1418 }
 0x7c7   :  { %v1392_v43 = vadd.f32 %v1388_v12, %v1364_v48  ;;  %v1424_v32 = vadd.f32 %v1419_v15, %v1403_v28 }
 0x7c9   :  { %v1404_v51 = vadd.f32 %v1402_v21, %v1392_v43 }
 0x7ca   :  { %v1421_v46 = vpop.permute.xlu0 %1420  ;;  %v1200_v41 = vpop.permute.xlu1 %1199 }
 0x7cb   :  { %v1206_v55 = vadd.f32 %v1200_v41, %v1179_v6  ;;  %v1425_v31 = vadd.f32 %v1421_v46, %v1404_v51  ;;  %v1496_v46 = vmul.f32 %v1889_v18, %v2812_v33 }
 0x7ce   :  { %v1440_v54 = vpop.permute.xlu0 %1439  ;;  %v2899_v34 = vpop.permute.xlu1 %1441 }
 0x7cf   :  { %v1445_v4 = vadd.f32 %v1440_v54, %v1424_v32  ;;  %v1446_v62 = vadd.f32 %v2899_v34, %v1425_v31  ;;  %v1620_v54 = vrot.slane %v1614_v23, 3 }
 0x7d2   :  { %v1223_v53 = vpop.permute.xlu0 %1222  ;;  %v1225_v40 = vpop.permute.xlu1 %1224 }
 0x7d3   :  { %v1231_v60 = vadd.f32 %v1223_v53, %v1204_v45  ;;  %v1232_v45 = vadd.f32 %v1225_v40, %v2897_v1 }
 0x7d6   :  { %v1227_v35 = vpop.permute.xlu0 %1226  ;;  %v2901_v59 = vpop.permute.xlu1 %1460 }
 0x7d7   :  { %v1233_v53 = vadd.f32 %v1227_v35, %v1206_v55  ;;  %v1466_v49 = vadd.f32 %v2901_v59, %v1445_v4  ;;  %v1619_v35 = vrot.slane %v1613_v42, 3 }
 0x7d9   :  { %v1621_v52 = vsel %vm409_vm6, %v1619_v35, %v1620_v54 }
 0x7da   :  { %v2903_v11 = vpop.permute.xlu0 %1462  ;;  %v1250_v14 = vpop.permute.xlu1 %1249 }
 0x7db   :  { %v1258_v12 = vadd.f32 %v1250_v14, %v1231_v60  ;;  %v1467_v1 = vadd.f32 %v2903_v11, %v1446_v62  ;;  %v1623_v11 = vsel %vm409_vm6, %v1620_v54, %v1622_v30 }
 0x7dd   :  { %v1497_v15 = vadd.f32 %v1494_v3, %v1258_v12 }
 0x7de   :  { %v1252_v16 = vpop.permute.xlu0 %1251  ;;  %v1254_v50 = vpop.permute.xlu1 %1253 }
 0x7df   :  { %v1259_v41 = vadd.f32 %v1252_v16, %v1232_v45  ;;  %v1260_v14 = vadd.f32 %v1254_v50, %v1233_v53 }
 0x7e1   :  { %v1498_v16 = vadd.f32 %v1495_v25, %v1259_v41  ;;  %v1499_v50 = vadd.f32 %v1496_v46, %v1260_v14 }
 0x7e2   :  { %v1482_v22 = vpop.permute.xlu0 %1481  ;;  %v2911_v38 = vpop.permute.xlu1 %1483 }
 0x7e3   :  { %v1487_v57 = vadd.f32 %v1482_v22, %v1466_v49  ;;  %v1488_v34 = vadd.f32 %v2911_v38, %v1467_v1 }
 0x7e5   :  { %v1626_v19 = vadd.f32 %v1621_v52, %v1487_v57  ;;  %v1627_v22 = vadd.f32 %v1623_v11, %v1488_v34 }
 0x7e6   :  { %v1516_v36 = vpop.permute.xlu0 %1515  ;;  %v2913_v47 = vpop.permute.xlu1 %1517 }
 0x7e7   :  { %v1524_v40 = vadd.f32 %v1516_v36, %v1497_v15  ;;  %v1525_v59 = vadd.f32 %v2913_v47, %v1498_v16 }
 0x7ea   :  { %v1520_v24 = vpop.permute.xlu0 %1519  ;;  %v2919_v2 = vpop.permute.xlu1 %1648 }
 0x7eb   :  { %v1526_v27 = vadd.f32 %v1520_v24, %v1499_v50  ;;  %v1654_v38 = vadd.f32 %v2919_v2, %v1626_v19 }
 0x7ee   :  { %v2921_v56 = vpop.permute.xlu0 %1650  ;;  %v1543_v20 = vpop.permute.xlu1 %1542 }
 0x7ef   :  { %v1551_v61 = vadd.f32 %v1543_v20, %v1524_v40  ;;  %v1655_v43 = vadd.f32 %v2921_v56, %v1627_v22 }
 0x7f2   :  { %v1545_v8 = vpop.permute.xlu0 %1544  ;;  %v1547_v9 = vpop.permute.xlu1 %1546 }
 0x7f3   :  { %v1552_v48 = vadd.f32 %v1545_v8, %v1525_v59  ;;  %v1553_v5 = vadd.f32 %v1547_v9, %v1526_v27 }
 0x7f6   :  { %v1677_v29 = vpop.permute.xlu0 %1676  ;;  %v1679_v58 = vpop.permute.xlu1 %1678 }
 0x7f7   :  { %v1682_v10 = vadd.f32 %v1677_v29, %v1654_v38  ;;  %v1683_v21 = vadd.f32 %v1679_v58, %v1655_v43 }
 0x7fa   :  { %v1570_v17 = vpop.permute.xlu0 %1569  ;;  %v1572_v13 = vpop.permute.xlu1 %1571 }
 0x7fb   :  { %v1578_v33 = vadd.f32 %v1570_v17, %v1551_v61  ;;  %v1579_v20 = vadd.f32 %v1572_v13, %v1552_v48 }
 0x7fe   :  { %v1574_v7 = vpop.permute.xlu0 %1573  ;;  %v1705_v63 = vpop.permute.xlu1 %1704 }
 0x7ff   :  { %v1580_v26 = vadd.f32 %v1574_v7, %v1553_v5  ;;  %v1710_v8 = vadd.f32 %v1705_v63, %v1682_v10 }
 0x802   :  { %v1707_v36 = vpop.permute.xlu0 %1706  ;;  %v1597_v37 = vpop.permute.xlu1 %1596 }
 0x803   :  { %v1605_v44 = vadd.f32 %v1597_v37, %v1578_v33  ;;  %v1711_v9 = vadd.f32 %v1707_v36, %v1683_v21 }
 0x805   :  { %1910 = vst.msk [vmem:[%s2975_s3 + $0x2e] sm:$0xfc] %vm886_vm8, %v1605_v44 }
 0x806   :  { %v1599_v47 = vpop.permute.xlu0 %1598  ;;  %v1601_v24 = vpop.permute.xlu1 %1600 }
 0x807   :  { %v1606_v28 = vadd.f32 %v1599_v47, %v1579_v20  ;;  %v1607_v6 = vadd.f32 %v1601_v24, %v1580_v26 }
 0x809   :  { %1911 = vst.msk [vmem:[%s2975_s3 + $0x36] sm:$0xff] %vm881_vm7, %v1606_v28 }
 0x80a   :  { %1912 = vst.msk [vmem:[%s2975_s3 + $0x3e] sm:$0x1] %vm889_vm9, %v1607_v6  ;;  %v1733_v2 = vpop.permute.xlu0 %1732  ;;  %v1735_v56 = vpop.permute.xlu1 %1734 }
 0x80b   :  { %v1738_v51 = vadd.f32 %v1733_v2, %v1710_v8  ;;  %v1739_v60 = vadd.f32 %v1735_v56, %v1711_v9 }
 0x80d   :  { %1908 = vst.msk [vmem:[%s2975_s3 + $0x20] sm:$0xff] %vm881_vm7, %v1738_v51 }
 0x80e   :  { %1909 = vst.msk [vmem:[%s2975_s3 + $0x28] sm:$0x7f] %vm883_vm10, %v1739_v60 }

</bundles_post_ra>
